<compile_context>
chip_gen: v6e
topology: v6e:2x2x1
jax: 0.10.0
libtpu: 0.0.40
codegen_flags: <defaults>
</compile_context>

<pallas_src>
import functools

import jax
import jax.numpy as jnp
from jax.experimental import pallas as pl
from jax.experimental.pallas import tpu as pltpu


# ----------------------------- kernel ---------------------------------------

def _residual_block_kernel(x_ref,
                           ln1g_ref, ln1b_ref,
                           wqkv_ref, bqkv_ref,
                           wo_ref, bo_ref,
                           ln2g_ref, ln2b_ref,
                           wfc_ref, bfc_ref, wpr_ref, bpr_ref,
                           o_ref,
                           *, n_head: int):
    f32 = jnp.float32
    bf16 = jnp.bfloat16

    x = x_ref[...]                            # (L, D) residual stream, f32
    L, D = x.shape
    hd = D // n_head
    scale = float(hd) ** -0.5

    def layernorm(v, g, b):
        # LayerNorm subclass computes in float32, eps=1e-5
        mu = jnp.mean(v, axis=-1, keepdims=True)
        var = jnp.mean((v - mu) ** 2, axis=-1, keepdims=True)
        return (v - mu) * jax.lax.rsqrt(var + 1e-5) * g + b

    # ---- y = ln_1(x) ; y = self.attn(y, y, y) ------------------------------
    y = layernorm(x, ln1g_ref[...], ln1b_ref[...])

    # fused QKV projection: one MXU pass with N-dim = 3D, f32 accumulation
    qkv = jnp.dot(y.astype(bf16), wqkv_ref[...],
                  preferred_element_type=f32) + bqkv_ref[...]       # (L, 3D)

    q = qkv[:, 0 * D:1 * D] * scale           # fold softmax scale into q
    k = qkv[:, 1 * D:2 * D]
    v = qkv[:, 2 * D:3 * D]

    # head-major (H, L, hd) layout -> every einsum below is a clean batched
    # matmul (batch dim = head), no head re-interleave on the output side.
    def split_heads(t):
        return jnp.swapaxes(t.astype(bf16).reshape(L, n_head, hd), 0, 1)

    qh = split_heads(q)                        # (H, L, hd) bf16
    kh = split_heads(k)
    vh = split_heads(v)

    s = jnp.einsum('hqd,hkd->hqk', qh, kh,
                   preferred_element_type=f32)                      # (H, L, L)
    s = s - jnp.max(s, axis=-1, keepdims=True)
    p = jnp.exp(s)
    p = p * pl.reciprocal(jnp.sum(p, axis=-1, keepdims=True), approx=True)

    ctx = jnp.einsum('hqk,hkd->hqd', p.astype(bf16), vh,
                     preferred_element_type=f32)                    # (H, L, hd)

    # output projection applied per head (wo_ref is (H, hd, D)), then summed
    attn = jnp.einsum('hqd,hdD->hqD', ctx.astype(bf16), wo_ref[...],
                      preferred_element_type=f32)
    attn = jnp.sum(attn, axis=0) + bo_ref[...]                      # (L, D)

    # ---- first residual ----------------------------------------------------
    x1 = x + attn

    # ---- y = ln_2(x) ; y = mlp(y) -------------------------------------------
    y2 = layernorm(x1, ln2g_ref[...], ln2b_ref[...])
    h = jnp.dot(y2.astype(bf16), wfc_ref[...],
                preferred_element_type=f32) + bfc_ref[...]
    h = h * jax.nn.sigmoid(1.702 * h)                               # QuickGELU
    m = jnp.dot(h.astype(bf16), wpr_ref[...],
                preferred_element_type=f32) + bpr_ref[...]

    # ---- second residual ----------------------------------------------------
    o_ref[...] = (x1 + m).astype(o_ref.dtype)


# ----------------------------- params prep -----------------------------------

def prepare_params(p, n_head):
    """Fuse QKV, reshape wo per head, cast matmul weights to bf16."""
    D = p['wq'].shape[0]
    hd = D // n_head
    bf16, f32 = jnp.bfloat16, jnp.float32
    return {
        'ln1_g': p['ln1_g'].astype(f32), 'ln1_b': p['ln1_b'].astype(f32),
        'wqkv': jnp.concatenate([p['wq'], p['wk'], p['wv']], axis=1).astype(bf16),
        'bqkv': jnp.concatenate([p['bq'], p['bk'], p['bv']], axis=1).astype(f32),
        'wo_h': p['wo'].reshape(n_head, hd, D).astype(bf16),
        'bo': p['bo'].astype(f32),
        'ln2_g': p['ln2_g'].astype(f32), 'ln2_b': p['ln2_b'].astype(f32),
        'wfc': p['wfc'].astype(bf16), 'bfc': p['bfc'].astype(f32),
        'wpr': p['wpr'].astype(bf16), 'bpr': p['bpr'].astype(f32),
    }


# ----------------------------- wrapper ---------------------------------------

def residual_attention_block(x_lnd, prep, n_head):
    """x_lnd: (L, N, D) float32 (seq-first, like nn.MultiheadAttention)."""
    L, N, D = x_lnd.shape

    weight_args = (
        prep['ln1_g'], prep['ln1_b'],
        prep['wqkv'], prep['bqkv'],
        prep['wo_h'], prep['bo'],
        prep['ln2_g'], prep['ln2_b'],
        prep['wfc'], prep['bfc'], prep['wpr'], prep['bpr'],
    )
    # constant index_map -> weights are fetched once and stay VMEM-resident.
    full = lambda a: pl.BlockSpec(a.shape, lambda b: (0,) * a.ndim)

    kern = functools.partial(_residual_block_kernel, n_head=n_head)
    cparams = pltpu.CompilerParams(
        dimension_semantics=("parallel",),          # batch shards across TCs
        vmem_limit_bytes=48 * 1024 * 1024)

    if D % 128 == 0:
        # Zero-copy lane-blocked view: batch b owns lane columns [b*D,(b+1)*D)
        # -> no HBM transpose round-trips in the wrapper.
        x2 = x_lnd.reshape(L, N * D)
        out = pl.pallas_call(
            kern,
            out_shape=jax.ShapeDtypeStruct((L, N * D), jnp.float32),
            grid=(N,),
            in_specs=[pl.BlockSpec((L, D), lambda b: (0, b))]
                     + [full(a) for a in weight_args],
            out_specs=pl.BlockSpec((L, D), lambda b: (0, b)),
            compiler_params=cparams,
        )(x2, *weight_args)
        return out.reshape(L, N, D)

    # Fallback for D not a multiple of 128: transpose once to (N, L, D).
    x2 = jnp.transpose(x_lnd, (1, 0, 2)).reshape(N * L, D)
    out = pl.pallas_call(
        kern,
        out_shape=jax.ShapeDtypeStruct((N * L, D), jnp.float32),
        grid=(N,),
        in_specs=[pl.BlockSpec((L, D), lambda b: (b, 0))]
                 + [full(a) for a in weight_args],
        out_specs=pl.BlockSpec((L, D), lambda b: (b, 0)),
        compiler_params=cparams,
    )(x2, *weight_args)
    return jnp.transpose(out.reshape(N, L, D), (1, 0, 2))


# ----------------------------- reference (plain JAX, same precision policy) --

def reference_block(x_lnd, prep, n_head):
    f32, bf16 = jnp.float32, jnp.bfloat16
    L, N, D = x_lnd.shape
    hd = D // n_head
    scale = float(hd) ** -0.5

    def ln(v, g, b):
        mu = v.mean(-1, keepdims=True)
        var = ((v - mu) ** 2).mean(-1, keepdims=True)
        return (v - mu) / jnp.sqrt(var + 1e-5) * g + b

    x = jnp.transpose(x_lnd, (1, 0, 2)).astype(f32)        # (N, L, D)
    y = ln(x, prep['ln1_g'], prep['ln1_b'])
    qkv = jnp.einsum('nld,df->nlf', y.astype(bf16), prep['wqkv'],
                     preferred_element_type=f32) + prep['bqkv']
    q = qkv[..., 0 * D:1 * D] * scale
    k = qkv[..., 1 * D:2 * D]
    v = qkv[..., 2 * D:3 * D]
    qh = q.astype(bf16).reshape(N, L, n_head, hd)
    kh = k.astype(bf16).reshape(N, L, n_head, hd)
    vh = v.astype(bf16).reshape(N, L, n_head, hd)
    s = jnp.einsum('nqhd,nkhd->nhqk', qh, kh, preferred_element_type=f32)
    a = jax.nn.softmax(s, axis=-1)
    ctx = jnp.einsum('nhqk,nkhd->nhqd', a.astype(bf16), vh,
                     preferred_element_type=f32)
    attn = jnp.einsum('nhqd,hdf->nqf', ctx.astype(bf16), prep['wo_h'],
                      preferred_element_type=f32) + prep['bo']
    x = x + attn
    y = ln(x, prep['ln2_g'], prep['ln2_b'])
    h = jnp.einsum('nld,df->nlf', y.astype(bf16), prep['wfc'],
                   preferred_element_type=f32) + prep['bfc']
    h = h * jax.nn.sigmoid(1.702 * h)
    x = x + (jnp.einsum('nlf,fd->nld', h.astype(bf16), prep['wpr'],
                        preferred_element_type=f32) + prep['bpr'])
    return jnp.transpose(x, (1, 0, 2))


# ----------------------------- main -------------------------------------------

if __name__ == "__main__":
    L, N, D, H = 8, 2, 128, 4          # seq, batch, d_model, n_head  (hd = 32)
    key = jax.random.PRNGKey(0)
    keys = jax.random.split(key, 20)

    def w(k, shape, s=0.05):
        return jax.random.normal(k, shape, jnp.float32) * s

    # Synthetic parameters. Weight matrices are stored in "x @ W" orientation
    # (i.e. already transposed vs torch nn.Linear.weight).
    raw = {
        'ln1_g': 1.0 + w(keys[13], (1, D), 0.1), 'ln1_b': w(keys[14], (1, D), 0.1),
        'wq': w(keys[0], (D, D)), 'bq': w(keys[1], (1, D)),
        'wk': w(keys[2], (D, D)), 'bk': w(keys[3], (1, D)),
        'wv': w(keys[4], (D, D)), 'bv': w(keys[5], (1, D)),
        'wo': w(keys[6], (D, D)), 'bo': w(keys[7], (1, D)),
        'ln2_g': 1.0 + w(keys[15], (1, D), 0.1), 'ln2_b': w(keys[16], (1, D), 0.1),
        'wfc': w(keys[8], (D, 4 * D)), 'bfc': w(keys[9], (1, 4 * D)),
        'wpr': w(keys[10], (4 * D, D)), 'bpr': w(keys[11], (1, D)),
    }
    prep = prepare_params(raw, H)

    x = jax.random.normal(keys[12], (L, N, D), jnp.float32)

    out = residual_attention_block(x, prep, n_head=H)
    out = jax.block_until_ready(out)

    ref = reference_block(x, prep, H)
    assert out.shape == (L, N, D)
    max_err = float(jnp.max(jnp.abs(out - ref)))
    assert jnp.allclose(out, ref, atol=1e-2, rtol=1e-2), max_err

    print("KERNEL_OK")
</pallas_src>

<mosaic_0001>
module attributes {stable_mosaic.version = 11 : i64} {
  func.func @_residual_block_kernel(%arg0: i32, %arg1: memref<8x128xf32, #tpu.memory_space<vmem>>, %arg2: memref<1x128xf32, #tpu.memory_space<vmem>>, %arg3: memref<1x128xf32, #tpu.memory_space<vmem>>, %arg4: memref<128x384xbf16, #tpu.memory_space<vmem>>, %arg5: memref<1x384xf32, #tpu.memory_space<vmem>>, %arg6: memref<4x32x128xbf16, #tpu.memory_space<vmem>>, %arg7: memref<1x128xf32, #tpu.memory_space<vmem>>, %arg8: memref<1x128xf32, #tpu.memory_space<vmem>>, %arg9: memref<1x128xf32, #tpu.memory_space<vmem>>, %arg10: memref<128x512xbf16, #tpu.memory_space<vmem>>, %arg11: memref<1x512xf32, #tpu.memory_space<vmem>>, %arg12: memref<512x128xbf16, #tpu.memory_space<vmem>>, %arg13: memref<1x128xf32, #tpu.memory_space<vmem>>, %arg14: memref<8x128xf32, #tpu.memory_space<vmem>>) attributes {dimension_semantics = [#tpu.dimension_semantics<parallel>], iteration_bounds = array<i64: 2>, scalar_prefetch = 0 : i64, scratch_operands = 0 : i64, tpu.core_type = #tpu.core_type<tc>, window_params = [{transform_indices = @transform_0, window_bounds = array<i64: 8, 128>}, {pipeline_mode = #tpu.pipeline_mode<synchronous>, transform_indices = @transform_1, window_bounds = array<i64: 1, 128>}, {pipeline_mode = #tpu.pipeline_mode<synchronous>, transform_indices = @transform_2, window_bounds = array<i64: 1, 128>}, {pipeline_mode = #tpu.pipeline_mode<synchronous>, transform_indices = @transform_3, window_bounds = array<i64: 128, 384>}, {pipeline_mode = #tpu.pipeline_mode<synchronous>, transform_indices = @transform_4, window_bounds = array<i64: 1, 384>}, {pipeline_mode = #tpu.pipeline_mode<synchronous>, transform_indices = @transform_5, window_bounds = array<i64: 4, 32, 128>}, {pipeline_mode = #tpu.pipeline_mode<synchronous>, transform_indices = @transform_6, window_bounds = array<i64: 1, 128>}, {pipeline_mode = #tpu.pipeline_mode<synchronous>, transform_indices = @transform_7, window_bounds = array<i64: 1, 128>}, {pipeline_mode = #tpu.pipeline_mode<synchronous>, transform_indices = @transform_8, window_bounds = array<i64: 1, 128>}, {pipeline_mode = #tpu.pipeline_mode<synchronous>, transform_indices = @transform_9, window_bounds = array<i64: 128, 512>}, {pipeline_mode = #tpu.pipeline_mode<synchronous>, transform_indices = @transform_10, window_bounds = array<i64: 1, 512>}, {pipeline_mode = #tpu.pipeline_mode<synchronous>, transform_indices = @transform_11, window_bounds = array<i64: 512, 128>}, {pipeline_mode = #tpu.pipeline_mode<synchronous>, transform_indices = @transform_12, window_bounds = array<i64: 1, 128>}, {transform_indices = @transform_13, window_bounds = array<i64: 8, 128>}]} {
    %c0 = arith.constant 0 : index
    %c0_0 = arith.constant 0 : index
    %0 = vector.load %arg1[%c0, %c0_0] : memref<8x128xf32, #tpu.memory_space<vmem>>, vector<8x128xf32>
    %c0_1 = arith.constant 0 : index
    %c0_2 = arith.constant 0 : index
    %1 = vector.load %arg2[%c0_1, %c0_2] : memref<1x128xf32, #tpu.memory_space<vmem>>, vector<1x128xf32>
    %c0_3 = arith.constant 0 : index
    %c0_4 = arith.constant 0 : index
    %2 = vector.load %arg3[%c0_3, %c0_4] : memref<1x128xf32, #tpu.memory_space<vmem>>, vector<1x128xf32>
    %cst = arith.constant dense<0.000000e+00> : vector<8xf32>
    %3 = vector.multi_reduction <add>, %0, %cst [1] : vector<8x128xf32> to vector<8xf32>
    %4 = vector.shape_cast %3 : vector<8xf32> to vector<8x1xf32>
    %cst_5 = arith.constant 1.280000e+02 : f32
    %5 = vector.broadcast %cst_5 : f32 to vector<8x1xf32>
    %6 = arith.divf %4, %5 : vector<8x1xf32>
    %7 = vector.broadcast %6 : vector<8x1xf32> to vector<8x128xf32>
    %8 = arith.subf %0, %7 : vector<8x128xf32>
    %9 = arith.mulf %8, %8 : vector<8x128xf32>
    %cst_6 = arith.constant dense<0.000000e+00> : vector<8xf32>
    %10 = vector.multi_reduction <add>, %9, %cst_6 [1] : vector<8x128xf32> to vector<8xf32>
    %11 = vector.shape_cast %10 : vector<8xf32> to vector<8x1xf32>
    %cst_7 = arith.constant 1.280000e+02 : f32
    %12 = vector.broadcast %cst_7 : f32 to vector<8x1xf32>
    %13 = arith.divf %11, %12 : vector<8x1xf32>
    %14 = vector.broadcast %6 : vector<8x1xf32> to vector<8x128xf32>
    %15 = arith.subf %0, %14 : vector<8x128xf32>
    %cst_8 = arith.constant 9.99999974E-6 : f32
    %16 = vector.broadcast %cst_8 : f32 to vector<8x1xf32>
    %17 = arith.addf %13, %16 : vector<8x1xf32>
    %18 = math.rsqrt %17 : vector<8x1xf32>
    %19 = vector.broadcast %18 : vector<8x1xf32> to vector<8x128xf32>
    %20 = arith.mulf %15, %19 : vector<8x128xf32>
    %21 = vector.broadcast %1 : vector<1x128xf32> to vector<8x128xf32>
    %22 = arith.mulf %20, %21 : vector<8x128xf32>
    %23 = vector.broadcast %2 : vector<1x128xf32> to vector<8x128xf32>
    %24 = arith.addf %22, %23 : vector<8x128xf32>
    %25 = arith.truncf %24 : vector<8x128xf32> to vector<8x128xbf16>
    %c0_9 = arith.constant 0 : index
    %c0_10 = arith.constant 0 : index
    %26 = vector.load %arg4[%c0_9, %c0_10] : memref<128x384xbf16, #tpu.memory_space<vmem>>, vector<128x384xbf16>
    %cst_11 = arith.constant dense<0.000000e+00> : vector<8x384xf32>
    %27 = tpu.matmul %25, %26, %cst_11 {dimension_numbers = #tpu.dot_dimension_numbers<[1], [0], [0], [1], [0, 0, 1, 1], [], []>} : vector<8x128xbf16>, vector<128x384xbf16>, vector<8x384xf32> -> vector<8x384xf32>
    %c0_12 = arith.constant 0 : index
    %c0_13 = arith.constant 0 : index
    %28 = vector.load %arg5[%c0_12, %c0_13] : memref<1x384xf32, #tpu.memory_space<vmem>>, vector<1x384xf32>
    %29 = vector.broadcast %28 : vector<1x384xf32> to vector<8x384xf32>
    %30 = arith.addf %27, %29 : vector<8x384xf32>
    %31 = vector.extract_strided_slice %30 {offsets = [0, 0], sizes = [8, 128], strides = [1, 1]} : vector<8x384xf32> to vector<8x128xf32>
    %cst_14 = arith.constant 0.176776692 : f32
    %32 = vector.broadcast %cst_14 : f32 to vector<8x128xf32>
    %33 = arith.mulf %31, %32 : vector<8x128xf32>
    %34 = vector.extract_strided_slice %30 {offsets = [0, 128], sizes = [8, 128], strides = [1, 1]} : vector<8x384xf32> to vector<8x128xf32>
    %35 = vector.extract_strided_slice %30 {offsets = [0, 256], sizes = [8, 128], strides = [1, 1]} : vector<8x384xf32> to vector<8x128xf32>
    %36 = arith.truncf %33 : vector<8x128xf32> to vector<8x128xbf16>
    %37 = vector.shape_cast %36 : vector<8x128xbf16> to vector<8x4x32xbf16>
    %38 = tpu.transpose %37, [1, 0, 2] : vector<8x4x32xbf16> -> vector<4x8x32xbf16>
    %39 = arith.truncf %34 : vector<8x128xf32> to vector<8x128xbf16>
    %40 = vector.shape_cast %39 : vector<8x128xbf16> to vector<8x4x32xbf16>
    %41 = tpu.transpose %40, [1, 0, 2] : vector<8x4x32xbf16> -> vector<4x8x32xbf16>
    %42 = arith.truncf %35 : vector<8x128xf32> to vector<8x128xbf16>
    %43 = vector.shape_cast %42 : vector<8x128xbf16> to vector<8x4x32xbf16>
    %44 = tpu.transpose %43, [1, 0, 2] : vector<8x4x32xbf16> -> vector<4x8x32xbf16>
    "tpu.trace_start"() <{level = 10 : i32, message = "hqd,hkd->hqk"}> : () -> ()
    %cst_15 = arith.constant dense<0.000000e+00> : vector<4x8x8xf32>
    %45 = tpu.matmul %38, %41, %cst_15 {dimension_numbers = #tpu.dot_dimension_numbers<[2], [2], [1], [1], [0, 0, 0, 1, 1, 1], [0], [0]>} : vector<4x8x32xbf16>, vector<4x8x32xbf16>, vector<4x8x8xf32> -> vector<4x8x8xf32>
    "tpu.trace_stop"() : () -> ()
    %cst_16 = arith.constant dense<0xFF800000> : vector<4x8xf32>
    %46 = vector.multi_reduction <maximumf>, %45, %cst_16 [2] : vector<4x8x8xf32> to vector<4x8xf32>
    %47 = vector.shape_cast %46 : vector<4x8xf32> to vector<4x8x1xf32>
    %48 = vector.broadcast %47 : vector<4x8x1xf32> to vector<4x8x8xf32>
    %49 = arith.subf %45, %48 : vector<4x8x8xf32>
    %50 = math.exp %49 : vector<4x8x8xf32>
    %cst_17 = arith.constant dense<0.000000e+00> : vector<4x8xf32>
    %51 = vector.multi_reduction <add>, %50, %cst_17 [2] : vector<4x8x8xf32> to vector<4x8xf32>
    %52 = vector.shape_cast %51 : vector<4x8xf32> to vector<4x8x1xf32>
    %53 = tpu.reciprocal %52 {approx = true} : vector<4x8x1xf32> -> vector<4x8x1xf32>
    %54 = vector.broadcast %53 : vector<4x8x1xf32> to vector<4x8x8xf32>
    %55 = arith.mulf %50, %54 : vector<4x8x8xf32>
    %56 = arith.truncf %55 : vector<4x8x8xf32> to vector<4x8x8xbf16>
    "tpu.trace_start"() <{level = 10 : i32, message = "hqk,hkd->hqd"}> : () -> ()
    %cst_18 = arith.constant dense<0.000000e+00> : vector<4x8x32xf32>
    %57 = tpu.matmul %56, %44, %cst_18 {dimension_numbers = #tpu.dot_dimension_numbers<[2], [1], [1], [2], [0, 0, 0, 1, 1, 2], [0], [0]>} : vector<4x8x8xbf16>, vector<4x8x32xbf16>, vector<4x8x32xf32> -> vector<4x8x32xf32>
    "tpu.trace_stop"() : () -> ()
    %58 = arith.truncf %57 : vector<4x8x32xf32> to vector<4x8x32xbf16>
    %c0_19 = arith.constant 0 : index
    %c0_20 = arith.constant 0 : index
    %c0_21 = arith.constant 0 : index
    %59 = vector.load %arg6[%c0_19, %c0_20, %c0_21] : memref<4x32x128xbf16, #tpu.memory_space<vmem>>, vector<4x32x128xbf16>
    "tpu.trace_start"() <{level = 10 : i32, message = "hqd,hdD->hqD"}> : () -> ()
    %cst_22 = arith.constant dense<0.000000e+00> : vector<4x8x128xf32>
    %60 = tpu.matmul %58, %59, %cst_22 {dimension_numbers = #tpu.dot_dimension_numbers<[2], [1], [1], [2], [0, 0, 0, 1, 1, 2], [0], [0]>} : vector<4x8x32xbf16>, vector<4x32x128xbf16>, vector<4x8x128xf32> -> vector<4x8x128xf32>
    "tpu.trace_stop"() : () -> ()
    %cst_23 = arith.constant dense<0.000000e+00> : vector<8x128xf32>
    %61 = vector.multi_reduction <add>, %60, %cst_23 [0] : vector<4x8x128xf32> to vector<8x128xf32>
    %c0_24 = arith.constant 0 : index
    %c0_25 = arith.constant 0 : index
    %62 = vector.load %arg7[%c0_24, %c0_25] : memref<1x128xf32, #tpu.memory_space<vmem>>, vector<1x128xf32>
    %63 = vector.broadcast %62 : vector<1x128xf32> to vector<8x128xf32>
    %64 = arith.addf %61, %63 : vector<8x128xf32>
    %65 = arith.addf %0, %64 : vector<8x128xf32>
    %c0_26 = arith.constant 0 : index
    %c0_27 = arith.constant 0 : index
    %66 = vector.load %arg8[%c0_26, %c0_27] : memref<1x128xf32, #tpu.memory_space<vmem>>, vector<1x128xf32>
    %c0_28 = arith.constant 0 : index
    %c0_29 = arith.constant 0 : index
    %67 = vector.load %arg9[%c0_28, %c0_29] : memref<1x128xf32, #tpu.memory_space<vmem>>, vector<1x128xf32>
    %cst_30 = arith.constant dense<0.000000e+00> : vector<8xf32>
    %68 = vector.multi_reduction <add>, %65, %cst_30 [1] : vector<8x128xf32> to vector<8xf32>
    %69 = vector.shape_cast %68 : vector<8xf32> to vector<8x1xf32>
    %cst_31 = arith.constant 1.280000e+02 : f32
    %70 = vector.broadcast %cst_31 : f32 to vector<8x1xf32>
    %71 = arith.divf %69, %70 : vector<8x1xf32>
    %72 = vector.broadcast %71 : vector<8x1xf32> to vector<8x128xf32>
    %73 = arith.subf %65, %72 : vector<8x128xf32>
    %74 = arith.mulf %73, %73 : vector<8x128xf32>
    %cst_32 = arith.constant dense<0.000000e+00> : vector<8xf32>
    %75 = vector.multi_reduction <add>, %74, %cst_32 [1] : vector<8x128xf32> to vector<8xf32>
    %76 = vector.shape_cast %75 : vector<8xf32> to vector<8x1xf32>
    %cst_33 = arith.constant 1.280000e+02 : f32
    %77 = vector.broadcast %cst_33 : f32 to vector<8x1xf32>
    %78 = arith.divf %76, %77 : vector<8x1xf32>
    %79 = vector.broadcast %71 : vector<8x1xf32> to vector<8x128xf32>
    %80 = arith.subf %65, %79 : vector<8x128xf32>
    %cst_34 = arith.constant 9.99999974E-6 : f32
    %81 = vector.broadcast %cst_34 : f32 to vector<8x1xf32>
    %82 = arith.addf %78, %81 : vector<8x1xf32>
    %83 = math.rsqrt %82 : vector<8x1xf32>
    %84 = vector.broadcast %83 : vector<8x1xf32> to vector<8x128xf32>
    %85 = arith.mulf %80, %84 : vector<8x128xf32>
    %86 = vector.broadcast %66 : vector<1x128xf32> to vector<8x128xf32>
    %87 = arith.mulf %85, %86 : vector<8x128xf32>
    %88 = vector.broadcast %67 : vector<1x128xf32> to vector<8x128xf32>
    %89 = arith.addf %87, %88 : vector<8x128xf32>
    %90 = arith.truncf %89 : vector<8x128xf32> to vector<8x128xbf16>
    %c0_35 = arith.constant 0 : index
    %c0_36 = arith.constant 0 : index
    %91 = vector.load %arg10[%c0_35, %c0_36] : memref<128x512xbf16, #tpu.memory_space<vmem>>, vector<128x512xbf16>
    %cst_37 = arith.constant dense<0.000000e+00> : vector<8x512xf32>
    %92 = tpu.matmul %90, %91, %cst_37 {dimension_numbers = #tpu.dot_dimension_numbers<[1], [0], [0], [1], [0, 0, 1, 1], [], []>} : vector<8x128xbf16>, vector<128x512xbf16>, vector<8x512xf32> -> vector<8x512xf32>
    %c0_38 = arith.constant 0 : index
    %c0_39 = arith.constant 0 : index
    %93 = vector.load %arg11[%c0_38, %c0_39] : memref<1x512xf32, #tpu.memory_space<vmem>>, vector<1x512xf32>
    %94 = vector.broadcast %93 : vector<1x512xf32> to vector<8x512xf32>
    %95 = arith.addf %92, %94 : vector<8x512xf32>
    %cst_40 = arith.constant 1.702000e+00 : f32
    %96 = vector.broadcast %cst_40 : f32 to vector<8x512xf32>
    %97 = arith.mulf %96, %95 : vector<8x512xf32>
    %98 = arith.negf %97 : vector<8x512xf32>
    %99 = math.exp %98 : vector<8x512xf32>
    %cst_41 = arith.constant 1.000000e+00 : f32
    %100 = vector.broadcast %cst_41 : f32 to vector<8x512xf32>
    %101 = arith.addf %100, %99 : vector<8x512xf32>
    %102 = arith.divf %100, %101 : vector<8x512xf32>
    %103 = arith.mulf %95, %102 : vector<8x512xf32>
    %104 = arith.truncf %103 : vector<8x512xf32> to vector<8x512xbf16>
    %c0_42 = arith.constant 0 : index
    %c0_43 = arith.constant 0 : index
    %105 = vector.load %arg12[%c0_42, %c0_43] : memref<512x128xbf16, #tpu.memory_space<vmem>>, vector<512x128xbf16>
    %cst_44 = arith.constant dense<0.000000e+00> : vector<8x128xf32>
    %106 = tpu.matmul %104, %105, %cst_44 {dimension_numbers = #tpu.dot_dimension_numbers<[1], [0], [0], [1], [0, 0, 1, 1], [], []>} : vector<8x512xbf16>, vector<512x128xbf16>, vector<8x128xf32> -> vector<8x128xf32>
    %c0_45 = arith.constant 0 : index
    %c0_46 = arith.constant 0 : index
    %107 = vector.load %arg13[%c0_45, %c0_46] : memref<1x128xf32, #tpu.memory_space<vmem>>, vector<1x128xf32>
    %108 = vector.broadcast %107 : vector<1x128xf32> to vector<8x128xf32>
    %109 = arith.addf %106, %108 : vector<8x128xf32>
    %110 = arith.addf %65, %109 : vector<8x128xf32>
    %c0_47 = arith.constant 0 : index
    %c0_48 = arith.constant 0 : index
    %111 = vector.load %arg14[%c0_47, %c0_48] : memref<8x128xf32, #tpu.memory_space<vmem>>, vector<8x128xf32>
    tpu.vector_store %arg14[%c0_47, %c0_48], %110 {strides = array<i32>} : memref<8x128xf32, #tpu.memory_space<vmem>>, vector<8x128xf32>,
    return
  }
  func.func @transform_0(%arg0: i32) -> (i32, i32) {
    %c0_i32 = arith.constant 0 : i32
    %c0_i32_0 = arith.constant 0 : i32
    return %c0_i32, %arg0 : i32, i32
  }
  func.func @transform_1(%arg0: i32) -> (i32, i32) {
    %c0_i32 = arith.constant 0 : i32
    %c0_i32_0 = arith.constant 0 : i32
    %c0_i32_1 = arith.constant 0 : i32
    return %c0_i32, %c0_i32_0 : i32, i32
  }
  func.func @transform_2(%arg0: i32) -> (i32, i32) {
    %c0_i32 = arith.constant 0 : i32
    %c0_i32_0 = arith.constant 0 : i32
    %c0_i32_1 = arith.constant 0 : i32
    return %c0_i32, %c0_i32_0 : i32, i32
  }
  func.func @transform_3(%arg0: i32) -> (i32, i32) {
    %c0_i32 = arith.constant 0 : i32
    %c0_i32_0 = arith.constant 0 : i32
    %c0_i32_1 = arith.constant 0 : i32
    return %c0_i32, %c0_i32_0 : i32, i32
  }
  func.func @transform_4(%arg0: i32) -> (i32, i32) {
    %c0_i32 = arith.constant 0 : i32
    %c0_i32_0 = arith.constant 0 : i32
    %c0_i32_1 = arith.constant 0 : i32
    return %c0_i32, %c0_i32_0 : i32, i32
  }
  func.func @transform_5(%arg0: i32) -> (i32, i32, i32) {
    %c0_i32 = arith.constant 0 : i32
    %c0_i32_0 = arith.constant 0 : i32
    %c0_i32_1 = arith.constant 0 : i32
    %c0_i32_2 = arith.constant 0 : i32
    return %c0_i32, %c0_i32_0, %c0_i32_1 : i32, i32, i32
  }
  func.func @transform_6(%arg0: i32) -> (i32, i32) {
    %c0_i32 = arith.constant 0 : i32
    %c0_i32_0 = arith.constant 0 : i32
    %c0_i32_1 = arith.constant 0 : i32
    return %c0_i32, %c0_i32_0 : i32, i32
  }
  func.func @transform_7(%arg0: i32) -> (i32, i32) {
    %c0_i32 = arith.constant 0 : i32
    %c0_i32_0 = arith.constant 0 : i32
    %c0_i32_1 = arith.constant 0 : i32
    return %c0_i32, %c0_i32_0 : i32, i32
  }
  func.func @transform_8(%arg0: i32) -> (i32, i32) {
    %c0_i32 = arith.constant 0 : i32
    %c0_i32_0 = arith.constant 0 : i32
    %c0_i32_1 = arith.constant 0 : i32
    return %c0_i32, %c0_i32_0 : i32, i32
  }
  func.func @transform_9(%arg0: i32) -> (i32, i32) {
    %c0_i32 = arith.constant 0 : i32
    %c0_i32_0 = arith.constant 0 : i32
    %c0_i32_1 = arith.constant 0 : i32
    return %c0_i32, %c0_i32_0 : i32, i32
  }
  func.func @transform_10(%arg0: i32) -> (i32, i32) {
    %c0_i32 = arith.constant 0 : i32
    %c0_i32_0 = arith.constant 0 : i32
    %c0_i32_1 = arith.constant 0 : i32
    return %c0_i32, %c0_i32_0 : i32, i32
  }
  func.func @transform_11(%arg0: i32) -> (i32, i32) {
    %c0_i32 = arith.constant 0 : i32
    %c0_i32_0 = arith.constant 0 : i32
    %c0_i32_1 = arith.constant 0 : i32
    return %c0_i32, %c0_i32_0 : i32, i32
  }
  func.func @transform_12(%arg0: i32) -> (i32, i32) {
    %c0_i32 = arith.constant 0 : i32
    %c0_i32_0 = arith.constant 0 : i32
    %c0_i32_1 = arith.constant 0 : i32
    return %c0_i32, %c0_i32_0 : i32, i32
  }
  func.func @transform_13(%arg0: i32) -> (i32, i32) {
    %c0_i32 = arith.constant 0 : i32
    %c0_i32_0 = arith.constant 0 : i32
    return %c0_i32, %arg0 : i32, i32
  }
}

</mosaic_0001>

<bundles_post_ra>
// kernel: tpu_custom_call.1
= control target key start
LH: loop header
LB: loop body
LE: loop exit
PB: predicated region body
PF: predicated region fallthrough
CT: control target
= control target key end

     0   :  { %s4258_s0 = inlined_call_operand.hbm [shape: f32[8,256], index: 0, kind: input, shape index: {}]   ;;  %s4259_s1 = inlined_call_operand.hbm [shape: f32[1,128], index: 1, kind: input, shape index: {}]   ;;  %s4260_s2 = inlined_call_operand.hbm [shape: f32[1,128], index: 2, kind: input, shape index: {}]   ;;  %s4261_s3 = inlined_call_operand.hbm [shape: bf16[128,384], index: 3, kind: input, shape index: {}]   ;;  %s4262_s4 = inlined_call_operand.vmem [shape: f32[1,384], index: 4, kind: input, shape index: {}]   ;;  %s4263_s5 = inlined_call_operand.hbm [shape: bf16[4,32,128], index: 5, kind: input, shape index: {}]   ;;  %s4264_s6 = inlined_call_operand.vmem [shape: f32[1,128], index: 6, kind: input, shape index: {}]   ;;  %s4265_s7 = inlined_call_operand.vmem [shape: f32[1,128], index: 7, kind: input, shape index: {}]   ;;  %s4266_s8 = inlined_call_operand.vmem [shape: f32[1,128], index: 8, kind: input, shape index: {}]   ;;  %s4267_s9 = inlined_call_operand.hbm [shape: bf16[128,512], index: 9, kind: input, shape index: {}]   ;;  %s4268_s10 = inlined_call_operand.vmem [shape: f32[1,512], index: 10, kind: input, shape index: {}]   ;;  %s4269_s11 = inlined_call_operand.hbm [shape: bf16[512,128], index: 11, kind: input, shape index: {}]   ;;  %s4270_s12 = inlined_call_operand.vmem [shape: f32[1,128], index: 12, kind: input, shape index: {}]   ;;  %s4271_s13 = inlined_call_operand.hbm [shape: f32[8,256], index: 13, kind: output, shape index: {}]  }
   0x1   :  { %4277 = sst [smem:[#allocation22_spill]] %s4259_s1 }
   0x2   :  { %4278 = sst [smem:[#allocation23_spill]] %s4260_s2 }
   0x3   :  { %4279 = sst [smem:[#allocation24_spill]] %s4261_s3 }
   0x4   :  { %4280 = sst [smem:[#allocation25_spill]] %s4263_s5 }
   0x5   :  { %4281 = sst [smem:[#allocation26_spill]] %s4267_s9 }
   0x6   :  { %4282 = sst [smem:[#allocation27_spill]] %s4269_s11 }
   0x7   :  { %18 = vsyncpa [#allocation3], 0 }
   0x8   :  { %20 = vsyncpa [#allocation3 + $0x1], 0 }
   0x9   :  { %21 = vsyncpa [#allocation6], 0 }
   0xa   :  { %22 = vsyncpa [#allocation9], 0 }
   0xb   :  { %23 = vsyncpa [#allocation12], 0 }
   0xc   :  { %24 = vsyncpa [#allocation4], 0 }
   0xd   :  { %26 = vsyncpa [#allocation4 + $0x1], 0  ;;  %s3808_s25 = smov 0   ;;  %s3810_s26 = smov 0  }
   0xe   :  { %s3812_s27 = smov 0   ;;  %s3814_s28 = smov 0  }
   0xf LB: > { %4283 = sst [smem:[#allocation20_spill]] %s3710_s27  ;;  %s3716_s29 = smov [#allocation5]   ;;  %s3714_s28 = sphi %s3814_s28, %s4315_s28   ;;  %s3710_s27 = sphi %s3812_s27, %s4312_s27   ;;  %s3706_s26 = sphi %s3810_s26, %s4314_s26   ;;  %s3702_s25 = sphi %s3808_s25, %s4313_s25  }
  0x10   : > { %s354_s30 = sshll.u32 %s3716_s29, 4  ;;  %s3829_s14 = sadd.s32 4294967295, %s3714_s28   ;;  %s355_s30 = int_to_ptr.vmem [resolvable:$true] %s354_s30 }
  0x11   : > { %p2854_p0 = scmp.ge.s32.totalorder %s3714_s28, 1  ;;  %p4272_p1 = scmp.eq.s32.totalorder %s3829_s14, 0 }
  0x12   : > { %p341_p2 = scmp.lt.s32.totalorder %s3714_s28, 3  ;;  %s3717_s16 = smov [#allocation8]  }
  0x13   : > { %s375_s17 = sshll.u32 %s3717_s16, 4  ;;  %s3718_s19 = smov [#allocation11]   ;;  %s3841_s17 = int_to_ptr.vmem [resolvable:$true] %s375_s17 }
  0x14   : > { %p3834_p3 = pnand %p2854_p0, %p341_p2  ;;  %s413_s20 = sshll.u32 %s3718_s19, 4  ;;  %s3849_s20 = int_to_ptr.vmem [resolvable:$true] %s413_s20 }
  0x15   : > { %s3465_s22 = scalar_lea.vmem %s355_s30, 16  ;;  %s3472_s23 = scalar_lea.vmem %s355_s30, 32 }
  0x16   : > { %s4284_s15 = scalar_select %p3834_p3, 1, 0 }
  0x17   : > { %p3204_p5 = pneg %p3834_p3  ;;  %p3466_p8 = scmp.ne.s32.totalorder %s355_s30, %s3465_s22 }
  0x18   : > { %p3473_p11 = scmp.lt.s32.totalorder %s355_s30, %s355_s30  ;;  %p3474_p12 = scmp.lt.s32.totalorder %s3472_s23, %s3465_s22 }
  0x19   : > { %p3845_p6 = pnand %p3204_p5, %p4272_p1 }
  0x1a   : > { %p3475_p13 = por %p3474_p12, %p3473_p11 }
  0x1b   : > { %p3853_p7 = pneg %p3845_p6 }
  0x1d   : > { %p3468_p9 = pnand %p3466_p8, %p3853_p7 }
  0x1f   : > { %p3469_p10 = pneg %p3468_p9 }
  0x21   : > { %p3476_p0 = pnand %p3475_p13, %p3469_p10 }
  0x23   : > { %3479 = shalt.err (!%p3476_p0)
}
  0x24   : > { %s4287_s1 = sld [smem:[#allocation22_spill]]  ;;  %s3491_s16 = scalar_lea.vmem %s3841_s17, 3072 }
  0x25   : > { %p3492_p2 = scmp.ne.s32.totalorder %s3841_s17, %s3491_s16  ;;  %p3499_p9 = scmp.lt.s32.totalorder %s3841_s17, %s3841_s17 }
  0x26   : > { %p3500_p11 = scmp.lt.s32.totalorder %s3491_s16, %s3491_s16 }
  0x27   : > { %p3494_p5 = pnand %p3492_p2, %p3853_p7 }
  0x28   : > { %p3501_p10 = por %p3500_p11, %p3499_p9 }
  0x29   : > { %p3495_p8 = pneg %p3494_p5 }
  0x2a   : > { %3207 = dma.hbm_to_vmem [thread:$0]  (!%p3845_p6), %s4287_s1, 16, %s355_s30, [#allocation6]  }
  0x2b   : > { %p3502_p12 = pnand %p3501_p10, %p3495_p8 }
  0x2d   : > { %3505 = shalt.err (!%p3502_p12)
}
  0x2e   : > { %s3719_s19 = smov 192   ;;  %s3720_s22 = smov 12  }
  0x2f   : > { %s4288_s3 = sld [smem:[#allocation24_spill]]  ;;  %s3517_s24 = scalar_lea.vmem %s3849_s20, 4096 }
  0x30   : > { %p3518_p13 = scmp.ne.s32.totalorder %s3849_s20, %s3517_s24  ;;  %p3525_p5 = scmp.lt.s32.totalorder %s3849_s20, %s3849_s20 }
  0x31   : > { %p3526_p8 = scmp.lt.s32.totalorder %s3517_s24, %s3517_s24 }
  0x32   : > { %p3520_p0 = pnand %p3518_p13, %p3853_p7 }
  0x33   : > { %p3527_p9 = por %p3526_p8, %p3525_p5 }
  0x34   : > { %p3521_p2 = pneg %p3520_p0 }
  0x35   : > { %3213 = dma.hbm_to_vmem [thread:$0]  (!%p3845_p6), %s4288_s3, 3072, %s3841_s17, [#allocation9], %s3719_s19, %s3719_s19, %s3720_s22  }
  0x36   : > { %p3528_p11 = pnand %p3527_p9, %p3521_p2 }
  0x38   : > { %3531 = shalt.err (!%p3528_p11)
}
  0x39   : > { %s3721_s29 = smov 256   ;;  %s3722_s16 = smov 16  }
  0x3a   : > { %s4289_s9 = sld [smem:[#allocation26_spill]]  ;;  %s3723_s17 = smov [#allocation7]  }
  0x3b   : > { %s365_s19 = sshll.u32 %s3723_s17, 4  ;;  %s3724_s22 = smov [#allocation10]   ;;  %s366_s19 = int_to_ptr.vmem [resolvable:$true] %s365_s19 }
  0x3c   : > { %s391_s23 = sshll.u32 %s3724_s22, 4  ;;  %s3543_s3 = scalar_lea.vmem %s366_s19, 16  ;;  %s392_s23 = int_to_ptr.vmem [resolvable:$true] %s391_s23 }
  0x3d   : > { %p3544_p10 = scmp.ne.s32.totalorder %s366_s19, %s3543_s3  ;;  %s3550_s24 = scalar_lea.vmem %s366_s19, 32 }
  0x3e   : > { %p3551_p0 = scmp.lt.s32.totalorder %s366_s19, %s366_s19  ;;  %p3552_p2 = scmp.lt.s32.totalorder %s3550_s24, %s3543_s3 }
  0x3f   : > { %p3546_p12 = pnand %p3544_p10, %p3853_p7 }
  0x40   : > { %3219 = dma.hbm_to_vmem [thread:$0]  (!%p3845_p6), %s4289_s9, 4096, %s3849_s20, [#allocation12], %s3721_s29, %s3721_s29, %s3722_s16  }
  0x41   : > { %p3547_p13 = pneg %p3546_p12  ;;  %p3553_p5 = por %p3552_p2, %p3551_p0 }
  0x43   : > { %p3554_p8 = pnand %p3553_p5, %p3547_p13 }
  0x45   : > { %3557 = shalt.err (!%p3554_p8)
}
  0x46   : > { %s4290_s2 = sld [smem:[#allocation23_spill]]  ;;  %s3569_s29 = scalar_lea.vmem %s392_s23, 1024 }
  0x47   : > { %p3570_p9 = scmp.ne.s32.totalorder %s392_s23, %s3569_s29  ;;  %p3577_p12 = scmp.lt.s32.totalorder %s392_s23, %s392_s23 }
  0x48   : > { %p3578_p4 = scmp.lt.s32.totalorder %s3569_s29, %s3569_s29 }
  0x49   : > { %p3572_p11 = pnand %p3570_p9, %p3853_p7 }
  0x4a   : > { %p3579_p1 = por %p3578_p4, %p3577_p12 }
  0x4b   : > { %p3573_p10 = pneg %p3572_p11 }
  0x4c   : > { %3210 = dma.hbm_to_vmem [thread:$0]  (!%p3845_p6), %s4290_s2, 16, %s366_s19, [#allocation6]  }
  0x4d   : > { %p3580_p3 = pnand %p3579_p1, %p3573_p10 }
  0x4f   : > { %3583 = shalt.err (!%p3580_p3)
}
  0x50   : > { %s3725_s3 = smov 64   ;;  %s3726_s16 = smov 4  }
  0x51   : > { %s4291_s5 = sld [smem:[#allocation25_spill]]  ;;  %s3727_s19 = smov [#allocation13]  }
  0x52   : > { %s429_s22 = sshll.u32 %s3727_s19, 4  ;;  %s430_s22 = int_to_ptr.vmem [resolvable:$true] %s429_s22 }
  0x53   : > { %s3595_s24 = scalar_lea.vmem %s430_s22, 4096  ;;  %p3603_p4 = scmp.lt.s32.totalorder %s430_s22, %s430_s22 }
  0x54   : > { %p3596_p13 = scmp.ne.s32.totalorder %s430_s22, %s3595_s24  ;;  %p3604_p1 = scmp.lt.s32.totalorder %s3595_s24, %s3595_s24 }
  0x56   : > { %p3598_p0 = pnand %p3596_p13, %p3853_p7  ;;  %p3605_p3 = por %p3604_p1, %p3603_p4 }
  0x57   : > { %3216 = dma.hbm_to_vmem [thread:$0]  (!%p3845_p6), %s4291_s5, 1024, %s392_s23, [#allocation9], %s3725_s3, %s3725_s3, %s3726_s16  }
  0x58   : > { %p3599_p2 = pneg %p3598_p0 }
  0x5a   : > { %p3606_p5 = pnand %p3605_p3, %p3599_p2 }
  0x5c   : > { %3609 = shalt.err (!%p3606_p5)
}
  0x5d   : > { %s4292_s11 = sld [smem:[#allocation27_spill]]  ;;  %s2853_s21 = sadd.s32 4294967294, %s3714_s28  }
  0x5e   : > { %s3911_s18 = sadd.s32 1, %s3714_s28   ;;  %s39_s29 = sadd.s32 1, %s3710_s27 }
  0x5f   : > { %s36_s23 = ssub.s32 %s3714_s28, %s3911_s18  ;;  %p46_p8 = scmp.ne.s32.totalorder %s3710_s27, %s3706_s26 }
  0x60   : > { %p37_p7 = scmp.eq.s32.totalorder %s36_s23, 0  ;;  %p47_p9 = scmp.eq.s32.totalorder %s3714_s28, 0 }
  0x61   : > { %p52_p11 = scmp.ne.s32.totalorder %s3706_s26, %s3702_s25  ;;  %p4295_p12 = scmp.eq.s32.totalorder %s3829_s14, 0 }
  0x62   : > { %s3922_s30 = scalar_select %p37_p7, %s3710_s27, %s39_s29  }
  0x63   : > { %3222 = dma.hbm_to_vmem [thread:$0]  (!%p3845_p6), %s4292_s11, 4096, %s430_s22, [#allocation12], %s3725_s3, %s3725_s3, %s3726_s16  }
  0x64   : > { %4293 = sst [smem:[#allocation21_spill]] %s3922_s30  ;;  %p3924_p10 = por %p47_p9, %p46_p8 }
  0x65   : > { %p3930_p6 = por %p4295_p12, %p52_p11  ;;  %p328_p13 = scmp.eq.s32.totalorder %s3829_s14, 1 }
  0x66   : > { %p334_p0 = scmp.eq.s32.totalorder %s2853_s21, 1  ;;  %p3237_p2 = scmp.lt.s32.totalorder %s3714_s28, 2 }
  0x67   : > { %s4296_s3 = scalar_select %p3930_p6, 1, 0 }
  0x68   : > { %s446_s16 = sand.u32 1, %s3710_s27   ;;  %p3937_p4 = por %p328_p13, %p46_p8 }
  0x69   : > { %p3941_p1 = por %p334_p0, %p52_p11  ;;  %s2862_s24 = sshll.u32 %s446_s16, 3 }
  0x6a   : > { %s4297_s19 = scalar_select %p3937_p4, 1, 0 }
  0x6b   : > { %s4298_s22 = scalar_select %p3941_p1, 1, 0 }
  0x6c   : > { %s2863_s1 = sshll.u32 %s3714_s28, 7  ;;  %s450_s21 = scalar_lea.vmem [#allocation2], %s2862_s24 }
  0x6d   : > { %s3949_s29 = scalar_lea.hbm %s4258_s0, %s2863_s1  ;;  %s457_s2 = sshll.u32 %s450_s21, 4  ;;  %s458_s2 = int_to_ptr.vmem [resolvable:$true] %s457_s2 }
  0x6e   : > { %p3953_p3 = pnand %p3237_p2, %p3924_p10  ;;  %s447_s9 = scalar_lea.sflag [#allocation3], %s446_s16 }
  0x6f   : > { %s3610_s11 = scalar_lea.hbm %s3949_s29, 128  ;;  %s3615_s23 = scalar_lea.hbm %s4258_s0, 256 }
  0x70   : > { %p3611_p5 = scmp.ne.s32.totalorder %s3949_s29, %s3610_s11  ;;  %p3612_p7 = pneg %p3953_p3 }
  0x71   : > { %p3616_p11 = scmp.lt.s32.totalorder %s3949_s29, %s4258_s0  ;;  %p3617_p10 = scmp.lt.s32.totalorder %s3615_s23, %s3610_s11 }
  0x72   : > { %p3613_p8 = pnand %p3612_p7, %p3611_p5 }
  0x73   : > { %p3618_p12 = por %p3617_p10, %p3616_p11 }
  0x74   : > { %p3614_p9 = pneg %p3613_p8 }
  0x76   : > { %p3619_p13 = pnand %p3618_p12, %p3614_p9 }
  0x78   : > { %3622 = shalt.err (!%p3619_p13)
}
  0x79   : > { %s3623_s17 = scalar_lea.vmem %s458_s2, 128  ;;  %s3728_s16 = smov [#allocation2]  }
  0x7a   : > { %p3624_p0 = scmp.ne.s32.totalorder %s458_s2, %s3623_s17  ;;  %s3628_s30 = sshll.u32 %s3728_s16, 4  ;;  %s3629_s30 = int_to_ptr.vmem [resolvable:$false] %s3628_s30 }
  0x7b   : > { %s3630_s27 = scalar_lea.vmem %s3629_s30, 256  ;;  %p3631_p5 = scmp.lt.s32.totalorder %s458_s2, %s3629_s30 }
  0x7c   : > { %p3626_p2 = pnand %p3624_p0, %p3612_p7  ;;  %p3632_p8 = scmp.lt.s32.totalorder %s3630_s27, %s3623_s17 }
  0x7e   : > { %p3627_p1 = pneg %p3626_p2  ;;  %p3633_p4 = por %p3632_p8, %p3631_p5 }
  0x80   : > { %p3634_p6 = pnand %p3633_p4, %p3627_p1 }
  0x82   : > { %3637 = shalt.err (!%p3634_p6)
}
  0x83   : > { %3226 = dma.hbm_to_vmem [thread:$0]  (!%p3953_p3), %s3949_s29, 128, %s458_s2, %s447_s9  }
  0x84   : > { %p4300_p9 = scmp.ne.s32.totalorder %s4284_s15, 0 }
  0x85   : > { %s3974_s11 = sand.u32 (!%p4300_p9), 1, %s3706_s26   ;;  %p4301_p6 = scmp.ne.s32.totalorder (!%p4300_p9), %s4296_s3, 0 }
  0x86   : > { %466 = sbr.rel (%p4300_p9) target bundleno = 2528 (0x9e0), region = 72  ;;  %s2865_s1 = sshll.u32 (!%p4300_p9), %s3974_s11, 3 }
  0x87   : > { %s469_s30 = scalar_lea.sflag (!%p4300_p9), [#allocation3], %s3974_s11  ;;  %s3980_s27 = scalar_lea.vmem (!%p4300_p9), [#allocation2], %s2865_s1 }
  0x8b   : > { %3681 = dma.done.wait (%p4301_p6), %s469_s30, 128  }
  0x8c   : > { %3683 = vsyncadd (%p4301_p6), %s469_s30, 4294967168  ;;  %p4302_p4 = scmp.eq.s32.totalorder %s3829_s14, 0 }
  0x8e   : > { %3685 = dma.done.wait (%p4302_p4), [#allocation6], 32   ;;  %p4303_p1 = pmov %p4302_p4 }
  0x90   : > { %3687 = vsyncadd (%p4303_p1), [#allocation6], 4294967264  ;;  %p4304_p3 = pmov %p4303_p1 }
  0x91   : > { %p4305_p7 = pmov %p4303_p1 }
  0x92   : > { %3689 = dma.done.wait (%p4304_p3), [#allocation9], 4096  }
  0x93   : > { %3691 = vsyncadd (%p4305_p7), [#allocation9], 4294963200  ;;  %p4306_p11 = pmov %p4303_p1 }
  0x94   : > { %p4307_p10 = pmov %p4303_p1 }
  0x95   : > { %3693 = dma.done.wait (%p4306_p11), [#allocation12], 8192  }
  0x96   : > { %3695 = vsyncadd (%p4307_p10), [#allocation12], 4294959104  ;;  %v540_v0 = vld [vmem:[%s3980_s27] sm:$0xff]  ;;  %v3729_v3 = vmov 0.0   ;;  %v3305_v12 = vld [vmem:[#allocation8 + $0x7c] ss:$12 sps:$4 sm:$0xff]   ;;  %v604_v41 = vlaneseq }
  0x97   : > { %543 = vadd.xlane.f32.xlu0 %v540_v0  ;;  %v3297_v1 = vld [vmem:[#allocation8 + $0xac] ss:$12 sps:$4 sm:$0xff]   ;;  %v3299_v2 = vld [vmem:[#allocation8 + $0xa8] ss:$12 sps:$4 sm:$0xff]   ;;  %3076 = vmatprep.subr.bf16.mxu1 %v3729_v3  ;;  %v3300_v4 = vld [vmem:[#allocation8 + $0xb0] ss:$12 sps:$4 sm:$0xff]  }
  0x98   : > { %v3301_v5 = vld [vmem:[#allocation8 + $0x94] ss:$12 sps:$4 sm:$0xff]   ;;  %v3303_v6 = vld [vmem:[#allocation8 + $0x90] ss:$12 sps:$4 sm:$0xff]   ;;  %747 = vmatprep.subr.bf16.mxu0 %v3297_v1  ;;  %v3304_v7 = vld [vmem:[#allocation8 + $0x98] ss:$12 sps:$4 sm:$0xff]   ;;  %3077 = vmatpush3.bf16.msra.mxu1 %v3300_v4 }
  0x99   : > { %748 = vmatpush1.bf16.msra.mxu0 %v3299_v2  ;;  %3078 = vmatprep.subr.bf16.mxu1 %v3729_v3  ;;  %v3307_v13 = vld [vmem:[#allocation8 + $0x78] ss:$12 sps:$4 sm:$0xff]   ;;  %v3308_v14 = vld [vmem:[#allocation8 + $0x80] ss:$12 sps:$4 sm:$0xff]   ;;  %v3312_v17 = vld [vmem:[#allocation8 + $0x68] ss:$12 sps:$4 sm:$0xff]  }
  0x9a   : > { %749 = vmatprep.subr.bf16.mxu0 %v3301_v5  ;;  %v3309_v15 = vld [vmem:[#allocation8 + $0x64] ss:$12 sps:$4 sm:$0xff]   ;;  %v3311_v16 = vld [vmem:[#allocation8 + $0x60] ss:$12 sps:$4 sm:$0xff]   ;;  %v3315_v19 = vld [vmem:[#allocation8 + $0x48] ss:$12 sps:$4 sm:$0xff]  }
  0x9b   : > { %v3313_v18 = vld [vmem:[#allocation8 + $0x4c] ss:$12 sps:$4 sm:$0xff]   ;;  %v3316_v20 = vld [vmem:[#allocation8 + $0x50] ss:$12 sps:$4 sm:$0xff]   ;;  %v3317_v21 = vld [vmem:[#allocation8 + $0x34] ss:$12 sps:$4 sm:$0xff]  }
  0x9c   : > { %3079 = vmatpush3.bf16.msra.mxu1 %v3304_v7  ;;  %v3730_v22 = vmov 0   ;;  %vm3731_vm0 = vmmov 0   ;;  %v3319_v23 = vld [vmem:[#allocation8 + $0x30] ss:$12 sps:$4 sm:$0xff]   ;;  %v3320_v24 = vld [vmem:[#allocation8 + $0x38] ss:$12 sps:$4 sm:$0xff]  }
  0x9d   : > { %750 = vmatpush1.bf16.msra.mxu0 %v3303_v6  ;;  %3080 = vmatprep.subr.bf16.mxu1 %v3729_v3  ;;  %v3321_v25 = vld [vmem:[#allocation8 + $0x1c] ss:$12 sps:$4 sm:$0xff]   ;;  %v3323_v26 = vld [vmem:[#allocation8 + $0x18] ss:$12 sps:$4 sm:$0xff]   ;;  %v3324_v27 = vld [vmem:[#allocation8 + $0x20] ss:$12 sps:$4 sm:$0xff]  }
  0x9e   : > { %751 = vmatprep.subr.bf16.mxu0 %v3305_v12  ;;  %779 = vmatprep.mubr.bf16.mxu0 %v3730_v22  ;;  %v3325_v28 = vld [vmem:[#allocation8 + $0x4] ss:$12 sps:$4 sm:$0xff]   ;;  %v3327_v29 = vld [vmem:[#allocation8] ss:$12 sps:$4 sm:$0xff]   ;;  %v3328_v30 = vld [vmem:[#allocation8 + $0x8] ss:$12 sps:$4 sm:$0xff]  }
  0x9f   : > { %3092 = vmatprep.mubr.msk.bf16.mxu1 %vm3731_vm0, %v3729_v3  ;;  %v2873_v35 = vld [vmem:[#allocation5] ss:$0 sm:$0xff]  ;;  %v2874_v37 = vld [vmem:[#allocation7] ss:$0 sm:$0xff]  ;;  %v4016_v42 = vshrl.u32 %v604_v41, 7  ;;  %s3732_s9 = smov 32  }
  0xa0   : > { %3081 = vmatpush3.bf16.msra.mxu1 %v3308_v14  ;;  %v4023_v45 = vld [vmem:[%s4262_s4] sm:$0x7]  ;;  %s3733_s15 = smov 96   ;;  %s3734_s3 = smov 64   ;;  %v3735_v61 = vmov 1983009808  }
  0xa1   : > { %752 = vmatpush1.bf16.msra.mxu0 %v3307_v13  ;;  %3082 = vmatprep.subr.bf16.mxu1 %v3729_v3  ;;  %v610_v43 = vsub.s32 1, %v4016_v42  ;;  %v606_v44 = vsub.s32 0, %v4016_v42  ;;  %v838_v62 = vunpack.c.l.s4 %v3735_v61  ;;  %v3736_v63 = vmov 1934713408   ;;  %s2992_s5 = sshll.u32 %s3829_s14, 7  ;;  %s2713_s23 = scalar_lea.sflag [#allocation4], %s3974_s11 }
  0xa2   : > { %753 = vmatprep.subr.bf16.mxu0 %v3309_v15  ;;  %vm1336_vm1 = vcmask 261120   ;;  %vm1521_vm2 = vcmask 64512   ;;  %vm1573_vm3 = vcmask 1043456   ;;  %s2724_s20 = scalar_lea.hbm %s4271_s13, %s2992_s5  ;;  %p4308_p13 = scmp.ne.s32.totalorder %s4297_s19, 0 }
  0xa3   : > { %v611_v46 = vrot.slane %v4023_v45, %v610_v43  ;;  %v607_v49 = vrot.slane %v4023_v45, %v606_v44  ;;  %v839_v1 = vunpack.c.0.s8 %v838_v62  ;;  %s3737_s14 = smov [#allocation14]  }
  0xa4   : > { %3083 = vmatpush3.bf16.msra.mxu1 %v3312_v17  ;;  %s3642_s21 = sshll.u32 %s3737_s14, 4  ;;  %s3643_s21 = int_to_ptr.vmem [resolvable:$false] %s3642_s21 }
  0xa5   : > { %754 = vmatpush1.bf16.msra.mxu0 %v3311_v16  ;;  %3084 = vmatprep.subr.bf16.mxu1 %v3729_v3  ;;  %v4040_v4 = vsub.s32 %v839_v1, %v4016_v42 }
  0xa6   : > { %755 = vmatprep.subr.bf16.mxu0 %v3313_v18 }
  0xa8   : > { %3085 = vmatpush3.bf16.msra.mxu1 %v3316_v20 }
  0xa9   : > { %756 = vmatpush1.bf16.msra.mxu0 %v3315_v19  ;;  %3086 = vmatprep.subr.bf16.mxu1 %v3729_v3 }
  0xaa   : > { %757 = vmatprep.subr.bf16.mxu0 %v3317_v21 }
  0xac   : > { %3087 = vmatpush3.bf16.msra.mxu1 %v3320_v24 }
  0xad   : > { %758 = vmatpush1.bf16.msra.mxu0 %v3319_v23  ;;  %3088 = vmatprep.subr.bf16.mxu1 %v3729_v3 }
  0xae   : > { %759 = vmatprep.subr.bf16.mxu0 %v3321_v25 }
  0xb0   : > { %3089 = vmatpush3.bf16.msra.mxu1 %v3324_v27 }
  0xb1   : > { %760 = vmatpush1.bf16.msra.mxu0 %v3323_v26  ;;  %3090 = vmatprep.subr.bf16.mxu1 %v3729_v3 }
  0xb2   : > { %761 = vmatprep.subr.bf16.mxu0 %v3325_v28 }
  0xb4   : > { %3091 = vmatpush3.bf16.msra.mxu1 %v3328_v30 }
  0xb5   : > { %762 = vmatpush1.bf16.msra.mxu0 %v3327_v29  ;;  %3102 = vmatprep.subr.bf16.mxu1 %v3729_v3 }
  0xb6   : > { %3096 = vmatprep.subr.bf16.mxu0 %v3729_v3 }
 0x120   : > { %v544_v8 = vpop.xlane.xlu0 %543 }
 0x121   : > { %v546_v9 = vmul.f32 0.0078125, %v544_v8 }
 0x123   : > { %v547_v10 = vsub.f32 %v540_v0, %v546_v9  ;;  %v855_v0 = vunpack.c.l.s4 %v3736_v63 }
 0x125   : > { %v548_v11 = vmul.f32 %v547_v10, %v547_v10  ;;  %v856_v2 = vunpack.c.0.s8 %v855_v0 }
 0x127   : > { %549 = vadd.xlane.f32.xlu0 %v548_v11  ;;  %v4043_v7 = vsub.s32 %v856_v2, %v4016_v42 }
 0x1b0   : > { %v550_v31 = vpop.xlane.xlu0 %549 }
 0x1b1   : > { %v551_v32 = vmul.f32 0.0078125, %v550_v31 }
 0x1b3   : > { %v552_v33 = vadd.f32 1e-05, %v551_v32 }
 0x1b5   : > { %3417 = vrsqrt.f32 %v552_v33 }
 0x1c2   : > { %v3418_v34 = vpop.eup %3417 }
 0x1c3   : > { %v554_v36 = vmul.f32 %v3418_v34, %v547_v10 }
 0x1c5   : > { %v561_v38 = vmul.f32 %v2873_v35, %v554_v36 }
 0x1c7   : > { %v568_v39 = vadd.f32 %v2874_v37, %v561_v38 }
 0x1c9   : > { %v569_v40 = vpack.c.bf16 %v568_v39, %v568_v39 }
 0x1cb   : > { %780 = vmatmul.mubr.bf16.vlgmr.msra.gmra.mxu0 %v569_v40  ;;  %3093 = vmatmul.mubr.bf16.vlgmr.msra.gmra.mxu1 %v569_v40 }
 0x1cc   : > { %3098 = vmatprep.mubr.msk.bf16.mxu0 %vm3731_vm0, %v3729_v3  ;;  %3104 = vmatprep.mubr.msk.bf16.mxu1 %vm3731_vm0, %v3729_v3 }
 0x28b   : > { %v781_v47 = vpop.f32.mrf.mxu0  ;;  %v4028_v48 = vpop.f32.mrf.mxu1 }
 0x28c   : > { %v782_v55 = vadd.f32 %v781_v47, %v607_v49 }
 0x28d   : > { %v783_v50 = vpop.f32.mrf.mxu0  ;;  %v3094_v51 = vpop.f32.mrf.mxu1 }
 0x28e   : > { %v784_v52 = vadd.f32 %v783_v50, %v611_v46  ;;  %v828_v59 = vmul.f32 0.17677669, %v782_v55 }
 0x28f   : > { %v785_v53 = vpop.f32.mrf.mxu0  ;;  %v825_v54 = vpop.f32.mrf.mxu1 }
 0x290   : > { %v998_v56 = vpack.c.bf16 %v784_v52, %v784_v52  ;;  %v829_v60 = vpack.c.bf16 %v828_v59, %v828_v59 }
 0x291   : > { %v786_v57 = vpop.f32.mrf.mxu0  ;;  %v3095_v58 = vpop.f32.mrf.mxu1 }
 0x292   : > { %1004 = vrot.lane.b32.xlu0 %v998_v56, %s3732_s9  ;;  %1000 = vrot.lane.b32.xlu1 %v998_v56, %s3733_s15  ;;  %v1012_v16 = vrot.slane %v998_v56, %v4040_v4  ;;  %v843_v28 = vrot.slane %v829_v60, %v4040_v4 }
 0x296   : > { %1002 = vrot.lane.b32.xlu1 %v998_v56, %s3734_s3 }
 0x29a   : > { %831 = vrot.lane.b32.xlu1 %v829_v60, %s3733_s15 }
 0x29e   : > { %833 = vrot.lane.b32.xlu1 %v829_v60, %s3734_s3 }
 0x2a2   : > { %835 = vrot.lane.b32.xlu1 %v829_v60, %s3732_s9 }
 0x304   : > { %v1005_v5 = vpop.permute.xlu0 %1004  ;;  %v1001_v6 = vpop.permute.xlu1 %1000 }
 0x305   : > { %v1054_v8 = vrot.slane %v1005_v5, %v4040_v4  ;;  %v1046_v9 = vrot.slane %v1001_v6, %v4040_v4 }
 0x307   : > { %v1055_v10 = vcombine.low %v1046_v9, %v1054_v8  ;;  %v1056_v11 = vcombine.high %v1046_v9, %v1054_v8 }
 0x308   : > { %v1003_v12 = vpop.permute.xlu1 %1002 }
 0x309   : > { %v1063_v13 = vrot.slane %v1055_v10, %v4043_v7  ;;  %v1070_v14 = vrot.slane %v1056_v11, %v4043_v7  ;;  %v1020_v15 = vrot.slane %v1003_v12, %v4040_v4 }
 0x30b   : > { %v1071_v17 = vcombine.high %v1063_v13, %v3730_v22  ;;  %v1021_v18 = vcombine.low %v1012_v16, %v1020_v15  ;;  %v1022_v19 = vcombine.high %v1012_v16, %v1020_v15  ;;  %v1072_v21 = vcombine.high %v1070_v14, %v3730_v22 }
 0x30c   : > { %v832_v20 = vpop.permute.xlu1 %831  ;;  %v1078_v25 = vshrl.u32 %v1063_v13, 16  ;;  %v1094_v27 = vshrl.u32 %v1070_v14, 16 }
 0x30d   : > { %v1029_v23 = vrot.slane %v1021_v18, %v4043_v7  ;;  %v1036_v24 = vrot.slane %v1022_v19, %v4043_v7  ;;  %v1086_v26 = vshrl.u32 %v1071_v17, 16  ;;  %v1102_v34 = vshrl.u32 %v1072_v21, 16 }
 0x30e   : > { %v877_v58 = vrot.slane %v832_v20, %v4040_v4 }
 0x30f   : > { %v1037_v29 = vcombine.high %v1029_v23, %v3730_v22  ;;  %v1038_v30 = vcombine.high %v1036_v24, %v3730_v22  ;;  %v1075_v31 = vpack.i.b16 %v1063_v13, %v1029_v23  ;;  %v1077_v32 = vshrl.u32 %v1029_v23, 16 }
 0x310   : > { %v834_v33 = vpop.permute.xlu1 %833  ;;  %v1091_v35 = vpack.i.b16 %v1070_v14, %v1036_v24  ;;  %v1093_v36 = vshrl.u32 %v1036_v24, 16 }
 0x311   : > { %v851_v37 = vrot.slane %v834_v33, %v4040_v4  ;;  %v1079_v38 = vpack.i.b16 %v1078_v25, %v1077_v32  ;;  %v1083_v39 = vpack.i.b16 %v1071_v17, %v1037_v29  ;;  %v1085_v40 = vshrl.u32 %v1037_v29, 16 }
 0x312   : > { %v1099_v41 = vpack.i.b16 %v1072_v21, %v1038_v30  ;;  %v1095_v46 = vpack.i.b16 %v1094_v27, %v1093_v36  ;;  %v1101_v47 = vshrl.u32 %v1038_v30, 16  ;;  %v1105_v49 = vcombine.low %v1075_v31, %v1091_v35 }
 0x313   : > { %v852_v50 = vcombine.low %v843_v28, %v851_v37  ;;  %v1087_v51 = vpack.i.b16 %v1086_v26, %v1085_v40  ;;  %v853_v53 = vcombine.high %v843_v28, %v851_v37 }
 0x314   : > { %v1113_v52 = vcombine.low %v1083_v39, %v1099_v41  ;;  %v836_v54 = vpop.permute.xlu1 %835  ;;  %v1103_v55 = vpack.i.b16 %v1102_v34, %v1101_v47  ;;  %v1130_v56 = vcombine.low %v1079_v38, %v1095_v46  ;;  %v1112_v62 = vrot.slane %v1105_v49, %v4040_v4 }
 0x315   : > { %v860_v57 = vrot.slane %v852_v50, %v4043_v7  ;;  %v867_v59 = vrot.slane %v853_v53, %v4043_v7  ;;  %v885_v60 = vrot.slane %v836_v54, %v4040_v4 }
 0x316   : > { %v1120_v61 = vrot.slane %v1113_v52, %v4040_v4  ;;  %v1138_v63 = vcombine.low %v1087_v51, %v1103_v55  ;;  %v1137_v8 = vrot.slane %v1130_v56, %v4040_v4 }
 0x317   : > { %v868_v0 = vcombine.high %v860_v57, %v3730_v22  ;;  %v886_v1 = vcombine.low %v877_v58, %v885_v60  ;;  %v887_v2 = vcombine.high %v877_v58, %v885_v60  ;;  %v869_v5 = vcombine.high %v867_v59, %v3730_v22 }
 0x318   : > { %v1121_v6 = vcombine.low %v1112_v62, %v1120_v61  ;;  %v1145_v9 = vrot.slane %v1138_v63, %v4040_v4  ;;  %v908_v10 = vshrl.u32 %v860_v57, 16  ;;  %v924_v14 = vshrl.u32 %v867_v59, 16 }
 0x319   : > { %v894_v11 = vrot.slane %v886_v1, %v4043_v7  ;;  %v901_v12 = vrot.slane %v887_v2, %v4043_v7  ;;  %v916_v13 = vshrl.u32 %v868_v0, 16  ;;  %v932_v21 = vshrl.u32 %v869_v5, 16 }
 0x31a   : > { %v1128_v15 = vrot.slane %v1121_v6, %v4043_v7  ;;  %v1146_v16 = vcombine.low %v1137_v8, %v1145_v9 }
 0x31b   : > { %v902_v17 = vcombine.high %v894_v11, %v3730_v22  ;;  %v903_v18 = vcombine.high %v901_v12, %v3730_v22  ;;  %v906_v19 = vpack.i.b16 %v894_v11, %v860_v57  ;;  %v909_v20 = vshrl.u32 %v894_v11, 16 }
 0x31c   : > { %v922_v23 = vpack.i.b16 %v901_v12, %v867_v59  ;;  %v925_v24 = vshrl.u32 %v901_v12, 16  ;;  %v1153_v25 = vrot.slane %v1146_v16, %v4043_v7  ;;  %v1158_v36 = vshrl.u32 %v1128_v15, 16 }
 0x31d   : > { %v910_v26 = vpack.i.b16 %v909_v20, %v908_v10  ;;  %v914_v27 = vpack.i.b16 %v902_v17, %v868_v0  ;;  %v917_v28 = vshrl.u32 %v902_v17, 16  ;;  %v930_v29 = vpack.i.b16 %v903_v18, %v869_v5 }
 0x31e   : > { %v926_v30 = vpack.i.b16 %v925_v24, %v924_v14  ;;  %v933_v31 = vshrl.u32 %v903_v18, 16  ;;  %v936_v32 = vcombine.low %v906_v19, %v922_v23  ;;  %v1157_v33 = vpack.i.b16 %v1153_v25, %v1128_v15 }
 0x31f   : > { %v918_v34 = vpack.i.b16 %v917_v28, %v916_v13  ;;  %v944_v35 = vcombine.low %v914_v27, %v930_v29  ;;  %v1159_v37 = vshrl.u32 %v1153_v25, 16  ;;  %v1154_v50 = vcombine.high %v1153_v25, %v3730_v22 }
 0x320   : > { %v934_v38 = vpack.i.b16 %v933_v31, %v932_v21  ;;  %v961_v39 = vcombine.low %v910_v26, %v926_v30  ;;  %v1341_v40 = vsel %vm1336_vm1, %v1157_v33, 0  ;;  %v943_v41 = vrot.slane %v936_v32, %v4040_v4 }
 0x321   : > { %v951_v46 = vrot.slane %v944_v35, %v4040_v4  ;;  %3097 = vmatpush3.bf16.xpose.msra.mxu0 %v1341_v40  ;;  %v1160_v47 = vpack.i.b16 %v1159_v37, %v1158_v36  ;;  %v1129_v55 = vcombine.high %v1128_v15, %v3730_v22  ;;  %v1165_v58 = vshrl.u32 %v1154_v50, 16 }
 0x322   : > { %v969_v49 = vcombine.low %v918_v34, %v934_v38  ;;  %3108 = vmatprep.subr.bf16.mxu0 %v3729_v3  ;;  %v968_v53 = vrot.slane %v961_v39, %v4040_v4  ;;  %v614_v35 = vsub.s32 2, %v4016_v42 }
 0x323   : > { %v952_v51 = vcombine.low %v943_v41, %v951_v46  ;;  %v1387_v52 = vsel %vm1336_vm1, %v1160_v47, 0  ;;  %v1163_v60 = vpack.i.b16 %v1154_v50, %v1129_v55  ;;  %v1164_v61 = vshrl.u32 %v1129_v55, 16 }
 0x324   : > { %v976_v54 = vrot.slane %v969_v49, %v4040_v4  ;;  %3103 = vmatpush3.bf16.xpose.msra.mxu1 %v1387_v52  ;;  %v615_v36 = vrot.slane %v4023_v45, %v614_v35 }
 0x325   : > { %3114 = vmatprep.subr.bf16.mxu1 %v3729_v3  ;;  %v959_v57 = vrot.slane %v952_v51, %v4043_v7  ;;  %v1166_v1 = vpack.i.b16 %v1165_v58, %v1164_v61  ;;  %v1433_v2 = vsel %vm1336_vm1, %v1163_v60, 0 }
 0x326   : > { %v977_v56 = vcombine.low %v968_v53, %v976_v54  ;;  %v823_v37 = vadd.f32 %v4028_v48, %v615_v36 }
 0x327   : > { %v989_v63 = vshrl.u32 %v959_v57, 16  ;;  %v1479_v8 = vsel %vm1336_vm1, %v1166_v1, 0  ;;  %v960_v9 = vcombine.high %v959_v57, %v3730_v22 }
 0x328   : > { %v984_v59 = vrot.slane %v977_v56, %v4043_v7  ;;  %v1167_v38 = vpack.c.bf16 %v823_v37, %v823_v37 }
 0x329   : > { %v995_v12 = vshrl.u32 %v960_v9, 16 }
 0x32a   : > { %v988_v62 = vpack.i.b16 %v984_v59, %v959_v57  ;;  %v990_v0 = vshrl.u32 %v984_v59, 16  ;;  %v985_v6 = vcombine.high %v984_v59, %v3730_v22 }
 0x32c   : > { %3099 = vmatmul.mubr.msk.bf16.vlgmr.msra.gmra.mxu0 %vm1336_vm1, %v988_v62  ;;  %v991_v5 = vpack.i.b16 %v990_v0, %v989_v63  ;;  %v996_v10 = vshrl.u32 %v985_v6, 16  ;;  %v994_v11 = vpack.i.b16 %v985_v6, %v960_v9  ;;  %v1181_v0 = vrot.slane %v1167_v38, %v4040_v4 }
 0x32d   : > { %3109 = vmatpush3.bf16.xpose.msra.mxu0 %v1433_v2  ;;  %3110 = vmatprep.mubr.msk.bf16.mxu0 %vm3731_vm0, %v3729_v3 }
 0x32e   : > { %3105 = vmatmul.mubr.msk.bf16.vlgmr.msra.gmra.mxu1 %vm1336_vm1, %v991_v5  ;;  %3120 = vmatprep.subr.bf16.mxu0 %v3729_v3  ;;  %v997_v13 = vpack.i.b16 %v996_v10, %v995_v12 }
 0x32f   : > { %3115 = vmatpush3.bf16.xpose.msra.mxu1 %v1479_v8  ;;  %3116 = vmatprep.mubr.msk.bf16.mxu1 %vm3731_vm0, %v3729_v3 }
 0x330   : > { %3126 = vmatprep.subr.bf16.mxu1 %v3729_v3 }
 0x334   : > { %3111 = vmatmul.mubr.msk.bf16.vlgmr.msra.gmra.mxu0 %vm1336_vm1, %v994_v11 }
 0x335   : > { %3122 = vmatprep.mubr.msk.bf16.mxu0 %vm3731_vm0, %v3729_v3 }
 0x336   : > { %3117 = vmatmul.mubr.msk.bf16.vlgmr.msra.gmra.mxu1 %vm1336_vm1, %v997_v13 }
 0x337   : > { %3128 = vmatprep.mubr.msk.bf16.mxu1 %vm3731_vm0, %v3729_v3 }
 0x3ec   : > { %v1377_v14 = vpop.f32.mrf.mxu0 }
 0x3ed   : > { %v1522_v15 = vsel %vm1521_vm2, %v1377_v14, -inf }
 0x3ee   : > { %v1423_v16 = vpop.f32.mrf.mxu1  ;;  %1523 = vmax.xlane.f32.xlu1 %v1522_v15  ;;  %v3100_v17 = vpop.f32.mrf.mxu0 }
 0x3ef   : > { %v1525_v18 = vsel %vm1521_vm2, %v1423_v16, -inf }
 0x3f0   : > { %1526 = vmax.xlane.f32.xlu0 %v1525_v18  ;;  %v1380_v19 = vpop.f32.mrf.mxu0  ;;  %v3106_v20 = vpop.f32.mrf.mxu1 }
 0x3f2   : > { %v3101_v21 = vpop.f32.mrf.mxu0  ;;  %v1426_v23 = vpop.f32.mrf.mxu1 }
 0x3f4   : > { %v3107_v24 = vpop.f32.mrf.mxu1  ;;  %v1469_v25 = vpop.f32.mrf.mxu0 }
 0x3f5   : > { %v1528_v26 = vsel %vm1521_vm2, %v1469_v25, -inf }
 0x3f6   : > { %v1515_v27 = vpop.f32.mrf.mxu1  ;;  %1529 = vmax.xlane.f32.xlu1 %v1528_v26  ;;  %v3112_v28 = vpop.f32.mrf.mxu0 }
 0x3f7   : > { %v1531_v31 = vsel %vm1521_vm2, %v1515_v27, -inf }
 0x3f8   : > { %v1472_v29 = vpop.f32.mrf.mxu0  ;;  %v3118_v30 = vpop.f32.mrf.mxu1 }
 0x3fa   : > { %v1518_v32 = vpop.f32.mrf.mxu1  ;;  %1532 = vmax.xlane.f32.xlu1 %v1531_v31  ;;  %v3113_v33 = vpop.f32.mrf.mxu0 }
 0x3fc   : > { %v3119_v34 = vpop.f32.mrf.mxu1 }
 0x40b   : > { %1171 = vrot.lane.b32.xlu1 %v1167_v38, %s3734_s3 }
 0x477   : > { %v1524_v39 = vpop.xlane.xlu1 %1523 }
 0x478   : > { %v1534_v40 = vsub.f32 %v1377_v14, %v1524_v39 }
 0x479   : > { %v1527_v41 = vpop.xlane.xlu0 %1526 }
 0x47a   : > { %v1538_v46 = vmul.f32 1.442695, %v1534_v40  ;;  %v1535_v47 = vsub.f32 %v1423_v16, %v1527_v41 }
 0x47c   : > { %3419 = vpow2.f32 %v1538_v46  ;;  %v1540_v49 = vmul.f32 1.442695, %v1535_v47 }
 0x47e   : > { %3421 = vpow2.f32 %v1540_v49 }
 0x47f   : > { %v1530_v48 = vpop.xlane.xlu1 %1529 }
 0x480   : > { %v1536_v54 = vsub.f32 %v1469_v25, %v1530_v48 }
 0x482   : > { %v1542_v56 = vmul.f32 1.442695, %v1536_v54 }
 0x483   : > { %v1533_v53 = vpop.xlane.xlu1 %1532 }
 0x484   : > { %v1537_v55 = vsub.f32 %v1515_v27, %v1533_v53  ;;  %3423 = vpow2.f32 %v1542_v56 }
 0x486   : > { %v1544_v57 = vmul.f32 1.442695, %v1537_v55 }
 0x487   : > { %v1172_v62 = vpop.permute.xlu1 %1171 }
 0x488   : > { %3425 = vpow2.f32 %v1544_v57  ;;  %v1189_v63 = vrot.slane %v1172_v62, %v4040_v4 }
 0x489   : > { %v4115_v50 = vpop.eup %3419 }
 0x48a   : > { %v1546_v51 = vsel %vm1521_vm2, %v4115_v50, 0.0  ;;  %v1190_v2 = vcombine.low %v1181_v0, %v1189_v63  ;;  %v1191_v6 = vcombine.high %v1181_v0, %v1189_v63 }
 0x48b   : > { %v4119_v52 = vpop.eup %3421  ;;  %1547 = vadd.xlane.f32.xlu0 %v1546_v51 }
 0x48c   : > { %v1549_v45 = vsel %vm1521_vm2, %v4119_v52, 0.0  ;;  %v1198_v9 = vrot.slane %v1190_v2, %v4043_v7  ;;  %v1205_v13 = vrot.slane %v1191_v6, %v4043_v7 }
 0x48d   : > { %1550 = vadd.xlane.f32.xlu1 %v1549_v45 }
 0x48e   : > { %v1206_v16 = vcombine.high %v1198_v9, %v3730_v22  ;;  %v1207_v19 = vcombine.high %v1205_v13, %v3730_v22  ;;  %v1246_v20 = vshrl.u32 %v1198_v9, 16  ;;  %v1262_v27 = vshrl.u32 %v1205_v13, 16 }
 0x490   : > { %v1254_v26 = vshrl.u32 %v1206_v16, 16  ;;  %v1270_v34 = vshrl.u32 %v1207_v19, 16 }
 0x491   : > { %v4125_v58 = vpop.eup %3423 }
 0x492   : > { %v1552_v60 = vsel %vm1521_vm2, %v4125_v58, 0.0 }
 0x495   : > { %v4127_v59 = vpop.eup %3425 }
 0x496   : > { %v1555_v61 = vsel %vm1521_vm2, %v4127_v59, 0.0 }
 0x49e   : > { %1173 = vrot.lane.b32.xlu1 %v1167_v38, %s3732_s9  ;;  %s538_s9 = scalar_lea.vmem [#allocation14], %s2865_s1  ;;  %s3644_s1 = scalar_lea.vmem %s3643_s21, 256 }
 0x4a1   : > { %1169 = vrot.lane.b32.xlu0 %v1167_v38, %s3733_s15  ;;  %s2726_s15 = sshll.u32 %s538_s9, 4  ;;  %s2727_s15 = int_to_ptr.vmem [resolvable:$true] %s2726_s15 }
 0x4a2   : > { %s3638_s24 = scalar_lea.vmem %s2727_s15, 128  ;;  %p3645_p5 = scmp.lt.s32.totalorder %s2727_s15, %s3643_s21 }
 0x4a3   : > { %p3639_p12 = scmp.ne.s32.totalorder %s2727_s15, %s3638_s24  ;;  %p3646_p8 = scmp.lt.s32.totalorder %s3644_s1, %s3638_s24 }
 0x4a5   : > { %p3640_p0 = pnand %p3639_p12, %p4308_p13  ;;  %p3647_p9 = por %p3646_p8, %p3645_p5 }
 0x4a7   : > { %p3641_p2 = pneg %p3640_p0 }
 0x4a9   : > { %p3648_p6 = pnand %p3647_p9, %p3641_p2 }
 0x4c0   : > { %1553 = vadd.xlane.f32.xlu0 %v1552_v60 }
 0x4c2   : > { %1556 = vadd.xlane.f32.xlu1 %v1555_v61 }
 0x514   : > { %v1548_v1 = vpop.xlane.xlu0 %1547 }
 0x515   : > { %3427 = vrcp.f32 %v1548_v1 }
 0x516   : > { %v1551_v5 = vpop.xlane.xlu1 %1550 }
 0x517   : > { %3429 = vrcp.f32 %v1551_v5 }
 0x518   : > { %v1170_v8 = vpop.permute.xlu0 %1169 }
 0x519   : > { %v1215_v11 = vrot.slane %v1170_v8, %v4040_v4 }
 0x51a   : > { %v1174_v10 = vpop.permute.xlu1 %1173 }
 0x51b   : > { %v1223_v12 = vrot.slane %v1174_v10, %v4040_v4 }
 0x51d   : > { %v1224_v14 = vcombine.low %v1215_v11, %v1223_v12  ;;  %v1225_v15 = vcombine.high %v1215_v11, %v1223_v12 }
 0x51f   : > { %v1232_v17 = vrot.slane %v1224_v14, %v4043_v7  ;;  %v1239_v18 = vrot.slane %v1225_v15, %v4043_v7 }
 0x521   : > { %v1240_v21 = vcombine.high %v1232_v17, %v3730_v22  ;;  %v1241_v23 = vcombine.high %v1239_v18, %v3730_v22  ;;  %v1244_v24 = vpack.i.b16 %v1232_v17, %v1198_v9  ;;  %v1247_v25 = vshrl.u32 %v1232_v17, 16 }
 0x522   : > { %v1260_v28 = vpack.i.b16 %v1239_v18, %v1205_v13  ;;  %v1263_v29 = vshrl.u32 %v1239_v18, 16  ;;  %v3428_v55 = vpop.eup %3427 }
 0x523   : > { %v1248_v30 = vpack.i.b16 %v1247_v25, %v1246_v20  ;;  %v1252_v31 = vpack.i.b16 %v1240_v21, %v1206_v16  ;;  %v1255_v32 = vshrl.u32 %v1240_v21, 16  ;;  %v1268_v33 = vpack.i.b16 %v1241_v23, %v1207_v19  ;;  %v3329_v19 = vld [vmem:[#allocation10 + $0x8] sm:$0xff]  }
 0x524   : > { %v1264_v36 = vpack.i.b16 %v1263_v29, %v1262_v27  ;;  %v1271_v37 = vshrl.u32 %v1241_v23, 16  ;;  %v1274_v38 = vcombine.low %v1244_v24, %v1260_v28  ;;  %v3430_v57 = vpop.eup %3429  ;;  %v1562_v62 = vmul.f32 %v3428_v55, %v4115_v50  ;;  %v3330_v23 = vld [vmem:[#allocation10 + $0x18] sm:$0xff]  }
 0x525   : > { %v1256_v39 = vpack.i.b16 %v1255_v32, %v1254_v26  ;;  %v1282_v40 = vcombine.low %v1252_v31, %v1268_v33  ;;  %v1563_v5 = vmul.f32 %v3430_v57, %v4119_v52  ;;  %v3333_v26 = vld [vmem:[#allocation10 + $0x28] sm:$0xff]  }
 0x526   : > { %v1272_v41 = vpack.i.b16 %v1271_v37, %v1270_v34  ;;  %v1299_v46 = vcombine.low %v1248_v30, %v1264_v36  ;;  %v1281_v47 = vrot.slane %v1274_v38, %v4040_v4  ;;  %v3334_v30 = vld [vmem:[#allocation10 + $0x38] sm:$0xff]   ;;  %v3335_v34 = vld [vmem:[#allocation10 + $0x20] sm:$0xff]   ;;  %v3336_v38 = vld [vmem:[#allocation10 + $0x30] sm:$0xff]  }
 0x527   : > { %v1289_v49 = vrot.slane %v1282_v40, %v4040_v4  ;;  %v1567_v13 = vpack.c.bf16 %v1563_v5, %v1563_v5 }
 0x528   : > { %v1307_v51 = vcombine.low %v1256_v39, %v1272_v41  ;;  %v1306_v48 = vrot.slane %v1299_v46, %v4040_v4 }
 0x529   : > { %v1290_v45 = vcombine.low %v1281_v47, %v1289_v49 }
 0x52a   : > { %v1314_v53 = vrot.slane %v1307_v51, %v4040_v4 }
 0x52b   : > { %v1297_v54 = vrot.slane %v1290_v45, %v4043_v7 }
 0x52c   : > { %v1315_v56 = vcombine.low %v1306_v48, %v1314_v53 }
 0x52d   : > { %v1298_v60 = vcombine.high %v1297_v54, %v3730_v22  ;;  %v1327_v0 = vshrl.u32 %v1297_v54, 16 }
 0x52e   : > { %v1322_v61 = vrot.slane %v1315_v56, %v4043_v7  ;;  %v1566_v7 = vpack.c.bf16 %v1562_v62, %v1562_v62 }
 0x52f   : > { %v1333_v4 = vshrl.u32 %v1298_v60, 16 }
 0x530   : > { %v1326_v63 = vpack.i.b16 %v1322_v61, %v1297_v54  ;;  %v1328_v1 = vshrl.u32 %v1322_v61, 16  ;;  %v1323_v2 = vcombine.high %v1322_v61, %v3730_v22 }
 0x532   : > { %v1575_v6 = vsel %vm1573_vm3, %v1326_v63, 0  ;;  %v1329_v8 = vpack.i.b16 %v1328_v1, %v1327_v0  ;;  %v1332_v9 = vpack.i.b16 %v1323_v2, %v1298_v60  ;;  %v1334_v10 = vshrl.u32 %v1323_v2, 16 }
 0x533   : > { %3121 = vmatpush3.bf16.msra.mxu0 %v1575_v6  ;;  %v2919_v6 = vld [vmem:[%s4264_s6] ss:$0 sm:$0xff] }
 0x534   : > { %v1621_v11 = vsel %vm1573_vm3, %v1329_v8, 0  ;;  %3132 = vmatprep.subr.bf16.mxu0 %v3729_v3  ;;  %v1335_v50 = vpack.i.b16 %v1334_v10, %v1333_v4  ;;  %v1667_v12 = vsel %vm1573_vm3, %v1332_v9, 0 }
 0x535   : > { %3127 = vmatpush3.bf16.msra.mxu1 %v1621_v11 }
 0x536   : > { %3123 = vmatmul.mubr.msk.bf16.vlgmr.msra.gmra.mxu0 %vm1521_vm2, %v1566_v7  ;;  %3138 = vmatprep.subr.bf16.mxu1 %v3729_v3  ;;  %v1713_v52 = vsel %vm1573_vm3, %v1335_v50, 0  ;;  %v3453_v50 = vld [vmem:[%s3980_s27] sm:$0xff] }
 0x537   : > { %3133 = vmatpush3.bf16.msra.mxu0 %v1667_v12  ;;  %3134 = vmatprep.mubr.msk.bf16.mxu0 %vm3731_vm0, %v3729_v3 }
 0x538   : > { %3129 = vmatmul.mubr.msk.bf16.vlgmr.msra.gmra.mxu1 %vm1521_vm2, %v1567_v13  ;;  %3144 = vmatprep.subr.bf16.mxu0 %v3729_v3 }
 0x539   : > { %3139 = vmatpush3.bf16.msra.mxu1 %v1713_v52  ;;  %3140 = vmatprep.mubr.msk.bf16.mxu1 %vm3731_vm0, %v3729_v3  ;;  %v3337_v52 = vld [vmem:[#allocation11 + $0xe0] ss:$16 sps:$4 sm:$0xff]  }
 0x53a   : > { %3152 = vmatprep.subr.bf16.mxu1 %v3729_v3 }
 0x549   : > { %v1554_v14 = vpop.xlane.xlu0 %1553 }
 0x54a   : > { %3431 = vrcp.f32 %v1554_v14  ;;  %v3339_v14 = vld [vmem:[#allocation11 + $0xe4] ss:$16 sps:$4 sm:$0xff]  }
 0x54b   : > { %v1557_v15 = vpop.xlane.xlu1 %1556 }
 0x54c   : > { %3433 = vrcp.f32 %v1557_v15  ;;  %v3340_v15 = vld [vmem:[#allocation11 + $0xe8] ss:$16 sps:$4 sm:$0xff]  }
 0x557   : > { %v3432_v16 = vpop.eup %3431 }
 0x558   : > { %v1564_v17 = vmul.f32 %v3432_v16, %v4125_v58  ;;  %v3331_v58 = vld [vmem:[#allocation10] sm:$0xff]   ;;  %v3342_v16 = vld [vmem:[#allocation11 + $0xec] ss:$16 sps:$4 sm:$0xff]  }
 0x559   : > { %v3434_v18 = vpop.eup %3433 }
 0x55a   : > { %v1568_v20 = vpack.c.bf16 %v1564_v17, %v1564_v17  ;;  %v1565_v21 = vmul.f32 %v3434_v18, %v4127_v59  ;;  %v3332_v59 = vld [vmem:[#allocation10 + $0x10] sm:$0xff]   ;;  %v3348_v18 = vld [vmem:[#allocation11 + $0xcc] ss:$16 sps:$4 sm:$0xff]  }
 0x55b   : > { %v3345_v17 = vld [vmem:[#allocation11 + $0xc4] ss:$16 sps:$4 sm:$0xff]  }
 0x55c   : > { %3135 = vmatmul.mubr.msk.bf16.vlgmr.msra.gmra.mxu0 %vm1521_vm2, %v1568_v20  ;;  %v1569_v24 = vpack.c.bf16 %v1565_v21, %v1565_v21  ;;  %v3346_v20 = vld [vmem:[#allocation11 + $0xc8] ss:$16 sps:$4 sm:$0xff]  }
 0x55d   : > { %3145 = vmatpush3.bf16.msra.mxu0 %v3329_v19  ;;  %3148 = vmatprep.mubr.msk.bf16.mxu0 %vm3731_vm0, %v3729_v3  ;;  %v3343_v19 = vld [vmem:[#allocation11 + $0xc0] ss:$16 sps:$4 sm:$0xff]  }
 0x55e   : > { %3141 = vmatmul.mubr.msk.bf16.vlgmr.msra.gmra.mxu1 %vm1521_vm2, %v1569_v24  ;;  %3146 = vmatprep.subr.bf16.mxu0 %v3729_v3 }
 0x55f   : > { %3153 = vmatpush3.bf16.msra.mxu1 %v3330_v23  ;;  %3156 = vmatprep.mubr.msk.bf16.mxu1 %vm3731_vm0, %v3729_v3 }
 0x560   : > { %3154 = vmatprep.subr.bf16.mxu1 %v3729_v3 }
 0x561   : > { %3147 = vmatpush3.bf16.msra.mxu0 %v3331_v58 }
 0x562   : > { %3160 = vmatprep.subr.bf16.mxu0 %v3729_v3 }
 0x563   : > { %3155 = vmatpush3.bf16.msra.mxu1 %v3332_v59  ;;  %v3351_v59 = vld [vmem:[#allocation11 + $0xa4] ss:$16 sps:$4 sm:$0xff]  }
 0x564   : > { %3168 = vmatprep.subr.bf16.mxu1 %v3729_v3 }
 0x5f6   : > { %v1611_v25 = vpop.f32.mrf.mxu0 }
 0x5f7   : > { %v1755_v27 = vpack.c.bf16 %v1611_v25, %v1611_v25  ;;  %v3354_v25 = vld [vmem:[#allocation11 + $0xac] ss:$16 sps:$4 sm:$0xff]  }
 0x5f8   : > { %v3124_v28 = vpop.f32.mrf.mxu0  ;;  %v1657_v29 = vpop.f32.mrf.mxu1 }
 0x5f9   : > { %v1756_v31 = vpack.c.bf16 %v1657_v29, %v1657_v29  ;;  %3149 = vmatmul.mubr.msk.bf16.vlgmr.msra.gmra.mxu0 %vm1336_vm1, %v1755_v27  ;;  %v3352_v27 = vld [vmem:[#allocation11 + $0xa8] ss:$16 sps:$4 sm:$0xff]   ;;  %v3357_v28 = vld [vmem:[#allocation11 + $0x84] ss:$16 sps:$4 sm:$0xff]   ;;  %v3360_v29 = vld [vmem:[#allocation11 + $0x8c] ss:$16 sps:$4 sm:$0xff]  }
 0x5fa   : > { %v1614_v32 = vpop.f32.mrf.mxu0  ;;  %v3130_v33 = vpop.f32.mrf.mxu1  ;;  %3161 = vmatpush3.bf16.msra.mxu0 %v3333_v26  ;;  %3164 = vmatprep.mubr.msk.bf16.mxu0 %vm3731_vm0, %v3729_v3  ;;  %v3349_v26 = vld [vmem:[#allocation11 + $0xa0] ss:$16 sps:$4 sm:$0xff]  }
 0x5fb   : > { %3157 = vmatmul.mubr.msk.bf16.vlgmr.msra.gmra.mxu1 %vm1336_vm1, %v1756_v31  ;;  %3162 = vmatprep.subr.bf16.mxu0 %v3729_v3  ;;  %v3358_v31 = vld [vmem:[#allocation11 + $0x88] ss:$16 sps:$4 sm:$0xff]   ;;  %v3363_v32 = vld [vmem:[#allocation11 + $0x64] ss:$16 sps:$4 sm:$0xff]   ;;  %v3366_v33 = vld [vmem:[#allocation11 + $0x6c] ss:$16 sps:$4 sm:$0xff]  }
 0x5fc   : > { %v3125_v36 = vpop.f32.mrf.mxu0  ;;  %v1660_v37 = vpop.f32.mrf.mxu1  ;;  %3169 = vmatpush3.bf16.msra.mxu1 %v3334_v30  ;;  %3172 = vmatprep.mubr.msk.bf16.mxu1 %vm3731_vm0, %v3729_v3  ;;  %v3355_v30 = vld [vmem:[#allocation11 + $0x80] ss:$16 sps:$4 sm:$0xff]  }
 0x5fd   : > { %3170 = vmatprep.subr.bf16.mxu1 %v3729_v3  ;;  %v3364_v36 = vld [vmem:[#allocation11 + $0x68] ss:$16 sps:$4 sm:$0xff]   ;;  %v3369_v37 = vld [vmem:[#allocation11 + $0x44] ss:$16 sps:$4 sm:$0xff]  }
 0x5fe   : > { %v3131_v39 = vpop.f32.mrf.mxu1  ;;  %3163 = vmatpush3.bf16.msra.mxu0 %v3335_v34  ;;  %v3361_v34 = vld [vmem:[#allocation11 + $0x60] ss:$16 sps:$4 sm:$0xff]  }
 0x5ff   : > { %2249 = vmatprep.subr.bf16.mxu0 %v3339_v14  ;;  %v3367_v39 = vld [vmem:[#allocation11 + $0x40] ss:$16 sps:$4 sm:$0xff]  }
 0x600   : > { %3171 = vmatpush3.bf16.msra.mxu1 %v3336_v38  ;;  %v3372_v38 = vld [vmem:[#allocation11 + $0x4c] ss:$16 sps:$4 sm:$0xff]   ;;  %v3399_v14 = vld [vmem:[#allocation13 + $0x20] sm:$0xff]  }
 0x601   : > { %2290 = vmatprep.subr.bf16.mxu1 %v3342_v16  ;;  %v3401_v16 = vld [vmem:[#allocation13 + $0x58] sm:$0xff]  }
 0x61c   : > { %v1703_v40 = vpop.f32.mrf.mxu0 }
 0x61d   : > { %v1757_v41 = vpack.c.bf16 %v1703_v40, %v1703_v40  ;;  %v3370_v40 = vld [vmem:[#allocation11 + $0x48] ss:$16 sps:$4 sm:$0xff]  }
 0x61e   : > { %v3136_v46 = vpop.f32.mrf.mxu0  ;;  %v1749_v47 = vpop.f32.mrf.mxu1 }
 0x61f   : > { %v1758_v49 = vpack.c.bf16 %v1749_v47, %v1749_v47  ;;  %3165 = vmatmul.mubr.msk.bf16.vlgmr.msra.gmra.mxu0 %vm1336_vm1, %v1757_v41  ;;  %v3375_v41 = vld [vmem:[#allocation11 + $0x24] ss:$16 sps:$4 sm:$0xff]   ;;  %v3378_v46 = vld [vmem:[#allocation11 + $0x2c] ss:$16 sps:$4 sm:$0xff]   ;;  %v3373_v47 = vld [vmem:[#allocation11 + $0x20] ss:$16 sps:$4 sm:$0xff]  }
 0x620   : > { %v1706_v51 = vpop.f32.mrf.mxu0  ;;  %v3142_v45 = vpop.f32.mrf.mxu1  ;;  %2281 = vmatprep.mubr.bf16.mxu0 %v3730_v22  ;;  %2250 = vmatpush1.bf16.msra.mxu0 %v3337_v52  ;;  %v3398_v52 = vld [vmem:[#allocation13 + $0xe0] sm:$0xff]  }
 0x621   : > { %3173 = vmatmul.mubr.msk.bf16.vlgmr.msra.gmra.mxu1 %vm1336_vm1, %v1758_v49  ;;  %2251 = vmatprep.subr.bf16.mxu0 %v3345_v17  ;;  %v3376_v49 = vld [vmem:[#allocation11 + $0x28] ss:$16 sps:$4 sm:$0xff]   ;;  %v3381_v51 = vld [vmem:[#allocation11 + $0x4] ss:$16 sps:$4 sm:$0xff]   ;;  %v3384_v45 = vld [vmem:[#allocation11 + $0xc] ss:$16 sps:$4 sm:$0xff]  }
 0x622   : > { %v3137_v48 = vpop.f32.mrf.mxu0  ;;  %v1752_v53 = vpop.f32.mrf.mxu1  ;;  %2322 = vmatprep.mubr.bf16.mxu1 %v3730_v22  ;;  %2291 = vmatpush1.bf16.msra.mxu1 %v3340_v15  ;;  %v3400_v15 = vld [vmem:[#allocation13 + $0xa0] sm:$0xff]   ;;  %v3402_v17 = vld [vmem:[#allocation13 + $0xd8] sm:$0xff]  }
 0x623   : > { %2292 = vmatprep.subr.bf16.mxu1 %v3348_v18  ;;  %v3379_v48 = vld [vmem:[#allocation11] ss:$16 sps:$4 sm:$0xff]   ;;  %v3382_v53 = vld [vmem:[#allocation11 + $0x8] ss:$16 sps:$4 sm:$0xff]  }
 0x624   : > { %v3143_v3 = vpop.f32.mrf.mxu1  ;;  %2252 = vmatpush1.bf16.msra.mxu0 %v3343_v19  ;;  %v3403_v18 = vld [vmem:[#allocation13 + $0x18] sm:$0xff]  }
 0x625   : > { %2253 = vmatprep.subr.bf16.mxu0 %v3351_v59  ;;  %v3404_v19 = vld [vmem:[#allocation13 + $0x98] sm:$0xff]   ;;  %v3410_v59 = vld [vmem:[#allocation13 + $0xc8] sm:$0xff]  }
 0x626   : > { %2293 = vmatpush1.bf16.msra.mxu1 %v3346_v20  ;;  %v3405_v20 = vld [vmem:[#allocation13 + $0x50] sm:$0xff]  }
 0x627   : > { %2294 = vmatprep.subr.bf16.mxu1 %v3354_v25  ;;  %v3411_v25 = vld [vmem:[#allocation13 + $0x8] sm:$0xff]  }
 0x628   : > { %2254 = vmatpush1.bf16.msra.mxu0 %v3349_v26  ;;  %v3412_v26 = vld [vmem:[#allocation13 + $0x88] sm:$0xff]  }
 0x629   : > { %2255 = vmatprep.subr.bf16.mxu0 %v3357_v28  ;;  %v3414_v28 = vld [vmem:[#allocation13 + $0xc0] sm:$0xff]  }
 0x62a   : > { %2295 = vmatpush1.bf16.msra.mxu1 %v3352_v27  ;;  %v3413_v27 = vld [vmem:[#allocation13 + $0x40] sm:$0xff]  }
 0x62b   : > { %2296 = vmatprep.subr.bf16.mxu1 %v3360_v29  ;;  %v3415_v29 = vld [vmem:[#allocation13] sm:$0xff]  }
 0x62c   : > { %2256 = vmatpush1.bf16.msra.mxu0 %v3355_v30  ;;  %v3416_v30 = vld [vmem:[#allocation13 + $0x80] sm:$0xff]  }
 0x62d   : > { %2257 = vmatprep.subr.bf16.mxu0 %v3363_v32  ;;  %v2083_v32 = vsub.s32 3, %v4016_v42 }
 0x62e   : > { %2297 = vmatpush1.bf16.msra.mxu1 %v3358_v31  ;;  %v2067_v31 = vld [vmem:[%s4268_s10] sm:$0xf] }
 0x62f   : > { %2298 = vmatprep.subr.bf16.mxu1 %v3366_v33  ;;  %v2072_v33 = vrot.slane %v2067_v31, %v606_v44 }
 0x630   : > { %2258 = vmatpush1.bf16.msra.mxu0 %v3361_v34  ;;  %v2080_v34 = vrot.slane %v2067_v31, %v614_v35 }
 0x631   : > { %2259 = vmatprep.subr.bf16.mxu0 %v3369_v37  ;;  %v2084_v37 = vrot.slane %v2067_v31, %v2083_v32 }
 0x632   : > { %2299 = vmatpush1.bf16.msra.mxu1 %v3364_v36  ;;  %v2076_v36 = vrot.slane %v2067_v31, %v610_v43 }
 0x633   : > { %2300 = vmatprep.subr.bf16.mxu1 %v3372_v38 }
 0x634   : > { %2260 = vmatpush1.bf16.msra.mxu0 %v3367_v39 }
 0x635   : > { %2261 = vmatprep.subr.bf16.mxu0 %v3375_v41 }
 0x636   : > { %2301 = vmatpush1.bf16.msra.mxu1 %v3370_v40 }
 0x637   : > { %2302 = vmatprep.subr.bf16.mxu1 %v3378_v46 }
 0x638   : > { %2262 = vmatpush1.bf16.msra.mxu0 %v3373_v47 }
 0x639   : > { %2263 = vmatprep.subr.bf16.mxu0 %v3381_v51 }
 0x63a   : > { %2303 = vmatpush1.bf16.msra.mxu1 %v3376_v49 }
 0x63b   : > { %2304 = vmatprep.subr.bf16.mxu1 %v3384_v45 }
 0x63c   : > { %2264 = vmatpush1.bf16.msra.mxu0 %v3379_v48 }
 0x63e   : > { %2305 = vmatpush1.bf16.msra.mxu1 %v3382_v53 }
 0x6b9   : > { %v1824_v54 = vpop.f32.mrf.mxu0 }
 0x6bb   : > { %v3150_v55 = vpop.f32.mrf.mxu0  ;;  %v1879_v56 = vpop.f32.mrf.mxu1 }
 0x6bc   : > { %v1995_v0 = vadd.f32 %v1879_v56, %v1824_v54 }
 0x6bd   : > { %v1827_v57 = vpop.f32.mrf.mxu0  ;;  %v3158_v60 = vpop.f32.mrf.mxu1 }
 0x6be   : > { %v2920_v57 = vld [vmem:[%s4265_s7] ss:$0 sm:$0xff] }
 0x6bf   : > { %v3151_v61 = vpop.f32.mrf.mxu0  ;;  %v1882_v62 = vpop.f32.mrf.mxu1 }
 0x6c0   : > { %v2921_v61 = vld [vmem:[%s4266_s8] ss:$0 sm:$0xff] }
 0x6c1   : > { %v3159_v63 = vpop.f32.mrf.mxu1 }
 0x6df   : > { %v1934_v1 = vpop.f32.mrf.mxu0 }
 0x6e0   : > { %v1996_v2 = vadd.f32 %v1995_v0, %v1934_v1  ;;  %v3385_v1 = vld [vmem:[#allocation13 + $0x78] sm:$0xff]  }
 0x6e1   : > { %v3166_v5 = vpop.f32.mrf.mxu0  ;;  %v1989_v4 = vpop.f32.mrf.mxu1  ;;  %3032 = vmatprep.subr.bf16.mxu0 %v3385_v1 }
 0x6e2   : > { %v1997_v22 = vadd.f32 %v1996_v2, %v1989_v4  ;;  %v3386_v2 = vld [vmem:[#allocation13 + $0xf8] sm:$0xff]  }
 0x6e3   : > { %v1937_v8 = vpop.f32.mrf.mxu0  ;;  %v3174_v9 = vpop.f32.mrf.mxu1  ;;  %v3387_v5 = vld [vmem:[#allocation13 + $0x38] sm:$0xff]   ;;  %3054 = vmatprep.subr.bf16.mxu1 %v3386_v2 }
 0x6e4   : > { %v2005_v10 = vadd.f32 %v2919_v6, %v1997_v22  ;;  %v3388_v4 = vld [vmem:[#allocation13 + $0xb8] sm:$0xff]   ;;  %v3389_v6 = vld [vmem:[#allocation13 + $0x70] sm:$0xff]  }
 0x6e5   : > { %v3167_v11 = vpop.f32.mrf.mxu0  ;;  %v1992_v7 = vpop.f32.mrf.mxu1  ;;  %v3390_v22 = vld [vmem:[#allocation13 + $0xf0] sm:$0xff]  }
 0x6e6   : > { %v4197_v12 = vadd.f32 %v3453_v50, %v2005_v10  ;;  %v3391_v8 = vld [vmem:[#allocation13 + $0x30] sm:$0xff]   ;;  %v3393_v10 = vld [vmem:[#allocation13 + $0x68] sm:$0xff]  }
 0x6e7   : > { %v3175_v13 = vpop.f32.mrf.mxu1  ;;  %v3392_v9 = vld [vmem:[#allocation13 + $0xb0] sm:$0xff]   ;;  %v3394_v11 = vld [vmem:[#allocation13 + $0xe8] sm:$0xff]  }
 0x6e8   : > { %2009 = vadd.xlane.f32.xlu0 %v4197_v12  ;;  %v3395_v7 = vld [vmem:[#allocation13 + $0x28] sm:$0xff]   ;;  %v3397_v13 = vld [vmem:[#allocation13 + $0x60] sm:$0xff]  }
 0x6e9   : > { %v3396_v50 = vld [vmem:[#allocation13 + $0xa8] sm:$0xff]  }
 0x771   : > { %v2010_v21 = vpop.xlane.xlu0 %2009 }
 0x772   : > { %v2011_v23 = vmul.f32 0.0078125, %v2010_v21  ;;  %v3406_v21 = vld [vmem:[#allocation13 + $0xd0] sm:$0xff]  }
 0x774   : > { %v2012_v24 = vsub.f32 %v4197_v12, %v2011_v23  ;;  %v3407_v23 = vld [vmem:[#allocation13 + $0x10] sm:$0xff]  }
 0x776   : > { %v2013_v58 = vmul.f32 %v2012_v24, %v2012_v24 }
 0x778   : > { %2014 = vadd.xlane.f32.xlu0 %v2013_v58  ;;  %v3409_v58 = vld [vmem:[#allocation13 + $0x48] sm:$0xff]  }
 0x801   : > { %v2015_v3 = vpop.xlane.xlu0 %2014 }
 0x802   : > { %v2016_v54 = vmul.f32 0.0078125, %v2015_v3 }
 0x804   : > { %v2017_v55 = vadd.f32 1e-05, %v2016_v54 }
 0x806   : > { %3435 = vrsqrt.f32 %v2017_v55 }
 0x813   : > { %v3436_v56 = vpop.eup %3435 }
 0x814   : > { %v2019_v60 = vmul.f32 %v3436_v56, %v2012_v24  ;;  %v3408_v24 = vld [vmem:[#allocation13 + $0x90] sm:$0xff]  }
 0x816   : > { %v2026_v62 = vmul.f32 %v2920_v57, %v2019_v60 }
 0x818   : > { %v2033_v63 = vadd.f32 %v2921_v61, %v2026_v62 }
 0x81a   : > { %v2034_v0 = vpack.c.bf16 %v2033_v63, %v2033_v63 }
 0x81c   : > { %2282 = vmatmul.mubr.bf16.vlgmr.msra.gmra.mxu0 %v2034_v0  ;;  %2323 = vmatmul.mubr.bf16.vlgmr.msra.gmra.mxu1 %v2034_v0 }
 0x81d   : > { %3033 = vmatpush3.bf16.msra.mxu0 %v3387_v5  ;;  %3055 = vmatpush3.bf16.msra.mxu1 %v3388_v4 }
 0x81e   : > { %3034 = vmatprep.subr.bf16.mxu0 %v3389_v6  ;;  %3056 = vmatprep.subr.bf16.mxu1 %v3390_v22 }
 0x821   : > { %3035 = vmatpush3.bf16.msra.mxu0 %v3391_v8  ;;  %3057 = vmatpush3.bf16.msra.mxu1 %v3392_v9 }
 0x822   : > { %3036 = vmatprep.subr.bf16.mxu0 %v3393_v10  ;;  %3058 = vmatprep.subr.bf16.mxu1 %v3394_v11 }
 0x825   : > { %3037 = vmatpush3.bf16.msra.mxu0 %v3395_v7  ;;  %3059 = vmatpush3.bf16.msra.mxu1 %v3396_v50 }
 0x826   : > { %3038 = vmatprep.subr.bf16.mxu0 %v3397_v13  ;;  %3060 = vmatprep.subr.bf16.mxu1 %v3398_v52 }
 0x829   : > { %3039 = vmatpush3.bf16.msra.mxu0 %v3399_v14  ;;  %3061 = vmatpush3.bf16.msra.mxu1 %v3400_v15 }
 0x82a   : > { %3040 = vmatprep.subr.bf16.mxu0 %v3401_v16  ;;  %3062 = vmatprep.subr.bf16.mxu1 %v3402_v17  ;;  %v2958_v17 = vld [vmem:[%s4270_s12] ss:$0 sm:$0xff] }
 0x82d   : > { %3041 = vmatpush3.bf16.msra.mxu0 %v3403_v18  ;;  %3063 = vmatpush3.bf16.msra.mxu1 %v3404_v19 }
 0x82e   : > { %3042 = vmatprep.subr.bf16.mxu0 %v3405_v20  ;;  %3064 = vmatprep.subr.bf16.mxu1 %v3406_v21 }
 0x831   : > { %3043 = vmatpush3.bf16.msra.mxu0 %v3407_v23  ;;  %3065 = vmatpush3.bf16.msra.mxu1 %v3408_v24 }
 0x832   : > { %3044 = vmatprep.subr.bf16.mxu0 %v3409_v58  ;;  %3066 = vmatprep.subr.bf16.mxu1 %v3410_v59 }
 0x835   : > { %3045 = vmatpush3.bf16.msra.mxu0 %v3411_v25  ;;  %3067 = vmatpush3.bf16.msra.mxu1 %v3412_v26 }
 0x836   : > { %3046 = vmatprep.subr.bf16.mxu0 %v3413_v27  ;;  %3068 = vmatprep.subr.bf16.mxu1 %v3414_v28 }
 0x839   : > { %3047 = vmatpush3.bf16.msra.mxu0 %v3415_v29  ;;  %3069 = vmatpush3.bf16.msra.mxu1 %v3416_v30 }
 0x8dc   : > { %v2283_v38 = vpop.f32.mrf.mxu0  ;;  %v2324_v39 = vpop.f32.mrf.mxu1 }
 0x8dd   : > { %v2284_v40 = vadd.f32 %v2283_v38, %v2072_v33  ;;  %v2325_v41 = vadd.f32 %v2324_v39, %v2080_v34 }
 0x8de   : > { %v2285_v46 = vpop.f32.mrf.mxu0  ;;  %v2326_v47 = vpop.f32.mrf.mxu1 }
 0x8df   : > { %v2954_v49 = vmul.f32 -1.702, %v2284_v40  ;;  %v2956_v51 = vmul.f32 -1.702, %v2325_v41  ;;  %v2286_v45 = vadd.f32 %v2285_v46, %v2076_v36  ;;  %v2327_v48 = vadd.f32 %v2326_v47, %v2084_v37 }
 0x8e0   : > { %v2287_v53 = vpop.f32.mrf.mxu0  ;;  %v2328_v3 = vpop.f32.mrf.mxu1 }
 0x8e1   : > { %v2339_v44 = vmul.f32 1.442695, %v2954_v49  ;;  %v2343_v54 = vmul.f32 1.442695, %v2956_v51  ;;  %v2955_v55 = vmul.f32 -1.702, %v2286_v45 }
 0x8e2   : > { %v2957_v35 = vmul.f32 -1.702, %v2327_v48  ;;  %v2288_v56 = vpop.f32.mrf.mxu0  ;;  %v2329_v42 = vpop.f32.mrf.mxu1 }
 0x8e3   : > { %3437 = vpow2.f32 %v2339_v44  ;;  %v2341_v43 = vmul.f32 1.442695, %v2955_v55 }
 0x8e4   : > { %3439 = vpow2.f32 %v2343_v54  ;;  %v2345_v57 = vmul.f32 1.442695, %v2957_v35 }
 0x8e5   : > { %3441 = vpow2.f32 %v2341_v43 }
 0x8e6   : > { %3443 = vpow2.f32 %v2345_v57 }
 0x8f0   : > { %v3438_v60 = vpop.eup %3437 }
 0x8f1   : > { %v3440_v61 = vpop.eup %3439  ;;  %v2347_v62 = vadd.f32 1.0, %v3438_v60 }
 0x8f2   : > { %v3442_v63 = vpop.eup %3441  ;;  %v2349_v0 = vadd.f32 1.0, %v3440_v61 }
 0x8f3   : > { %v3444_v1 = vpop.eup %3443  ;;  %3445 = vrcp.f32 %v2347_v62  ;;  %v2348_v2 = vadd.f32 1.0, %v3442_v63 }
 0x8f4   : > { %3447 = vrcp.f32 %v2349_v0  ;;  %v2350_v5 = vadd.f32 1.0, %v3444_v1 }
 0x8f5   : > { %3449 = vrcp.f32 %v2348_v2 }
 0x8f6   : > { %3451 = vrcp.f32 %v2350_v5 }
 0x900   : > { %v3446_v4 = vpop.eup %3445 }
 0x901   : > { %v3448_v6 = vpop.eup %3447  ;;  %v2359_v8 = vmul.f32 %v3446_v4, %v2284_v40 }
 0x902   : > { %v3450_v22 = vpop.eup %3449  ;;  %v2361_v10 = vmul.f32 %v3448_v6, %v2325_v41 }
 0x903   : > { %v3452_v9 = vpop.eup %3451  ;;  %v2360_v11 = vmul.f32 %v3450_v22, %v2286_v45  ;;  %v2363_v13 = vpack.c.bf16 %v2359_v8, %v2359_v8 }
 0x904   : > { %v2362_v7 = vmul.f32 %v3452_v9, %v2327_v48  ;;  %v2365_v14 = vpack.c.bf16 %v2361_v10, %v2361_v10 }
 0x905   : > { %v2364_v50 = vpack.c.bf16 %v2360_v11, %v2360_v11 }
 0x906   : > { %v2366_v52 = vpack.c.bf16 %v2362_v7, %v2362_v7 }
 0x907   : > { %2662 = vmatprep.mubr.bf16.mxu0 %v2364_v50 }
 0x908   : > { %2702 = vmatprep.mubr.bf16.mxu1 %v2366_v52  ;;  %2663 = vmatmul.mubr.bf16.vlgmr.msra.gmra.mxu0 %v2363_v13 }
 0x909   : > { %2703 = vmatmul.mubr.bf16.vlgmr.msra.gmra.mxu1 %v2365_v14 }
 0x9c8   : > { %v3048_v15 = vpop.f32.mrf.mxu0 }
 0x9c9   : > { %v3070_v16 = vpop.f32.mrf.mxu1 }
 0x9ca   : > { %v3049_v18 = vpop.f32.mrf.mxu0 }
 0x9cb   : > { %v3050_v19 = vadd.f32 %v3049_v18, %v3048_v15  ;;  %v3071_v20 = vpop.f32.mrf.mxu1 }
 0x9cc   : > { %v3051_v21 = vpop.f32.mrf.mxu0  ;;  %v3072_v24 = vadd.f32 %v3071_v20, %v3070_v16 }
 0x9cd   : > { %v2665_v23 = vadd.f32 %v3050_v19, %v2958_v17  ;;  %v3073_v58 = vpop.f32.mrf.mxu1 }
 0x9ce   : > { %v3052_v59 = vpop.f32.mrf.mxu0 }
 0x9cf   : > { %v2705_v25 = vadd.f32 %v3072_v24, %v2665_v23  ;;  %v3074_v26 = vpop.f32.mrf.mxu1 }
 0x9d1   : > { %v2710_v27 = vadd.f32 %v2705_v25, %v4197_v12 }
 0x9d3   : > { %2711 = vst [vmem:[%s538_s9] sm:$0xff] %v2710_v27 }
 0x9d4   : > { %3651 = shalt.err (!%p3648_p6)
}
 0x9d5   : > { %s3652_s17 = scalar_lea.hbm %s2724_s20, 128  ;;  %s3656_s30 = scalar_lea.hbm %s4271_s13, 256 }
 0x9d6   : > { %p3653_p4 = scmp.ne.s32.totalorder %s2724_s20, %s3652_s17  ;;  %p3657_p7 = scmp.lt.s32.totalorder %s2724_s20, %s4271_s13 }
 0x9d7   : > { %p3658_p11 = scmp.lt.s32.totalorder %s3656_s30, %s3652_s17 }
 0x9d8   : > { %p3654_p1 = pnand %p3653_p4, %p4308_p13 }
 0x9d9   : > { %p3659_p10 = por %p3658_p11, %p3657_p7 }
 0x9da   : > { %p3655_p3 = pneg %p3654_p1 }
 0x9dc   : > { %p3660_p12 = pnand %p3659_p10, %p3655_p3 }
 0x9de   : > { %3663 = shalt.err (!%p3660_p12)
}
 0x9df   : > { %3202 = dma.vmem_to_hbm [thread:$0]  (%p4308_p13), %s2727_s15, 128, %s2724_s20, %s2713_s23  }
 0x9e0 PF: > { %s2738_s5 = sand.u32 1, %s3702_s25   ;;  %p4309_p0 = scmp.ne.s32.totalorder %s4298_s22, 0 }
 0x9e1   : > { %p4310_p2 = scmp.ge.s32.totalorder %s3714_s28, 2  ;;  %s2739_s9 = scalar_lea.sflag [#allocation4], %s2738_s5 }
 0x9e3   : > { %p3228_p5 = pnand %p4310_p2, %p4309_p0 }
 0x9e5   : > { %p3229_p8 = pneg %p3228_p5 }
 0x9e7   : > { %3697 = dma.done.wait (%p3229_p8), %s2739_s9, 128  }
 0x9e8   : > { %3699 = vsyncadd (%p3229_p8), %s2739_s9, 4294967168  ;;  %s4311_s3 = sld [smem:[#allocation20_spill]]  ;;  %p29_p9 = scmp.ge.s32.totalorder %s3911_s18, 4  }
 0x9e9   : > { %s4312_s27 = sld [smem:[#allocation21_spill]]  ;;  %s4313_s25 = smov %s3706_s26 }
 0x9ea   : > { %s4315_s28 = smov %s3911_s18  ;;  %31 = sbr.rel (!%p29_p9) target bundleno = 15 (0xf), region = 141 }
 0x9ee   : > { %s4314_s26 = smov %s4311_s3 }
 0x9ef   :  { %2744 = vsyncpa [#allocation3], 1 }
 0x9f0   :  { %2746 = vsyncpa [#allocation3 + $0x1], 1 }
 0x9f1   :  { %2747 = vsyncpa [#allocation6], 1 }
 0x9f2   :  { %2748 = vsyncpa [#allocation9], 1 }
 0x9f3   :  { %2749 = vsyncpa [#allocation12], 1 }
 0x9f4   :  { %2750 = vsyncpa [#allocation4], 1 }
 0x9f5   :  { %2752 = vsyncpa [#allocation4 + $0x1], 1 }

</bundles_post_ra>
